<compile_context>
chip_gen: v7x
topology: tpu7x:2x2x1
jax: 0.10.0
libtpu: 0.0.40
codegen_flags: <defaults>
</compile_context>

<pallas_src>
import functools

import jax
import jax.numpy as jnp
from jax.experimental import pallas as pl
from jax.experimental.pallas import tpu as pltpu


def _conv_stats_kernel(x_ref, w_ref, y_ref, stats_ref, *, tile_h, width,
                       n_kh, n_kw, dil):
    """Implicit-im2col dilated conv tile + partial BatchNorm statistics.

    x_ref    : (KW, 1, Hp*W, Cin)   bf16  kw-shifted padded image (resident)
    w_ref    : (KH*KW, Cin, Cout_p) bf16  weights (resident)
    y_ref    : (tile_h*W, Cout_p)   f32   conv output tile
    stats_ref: (1, 2, Cout_p)       f32   [sum, sum_sq] of this tile
    """
    hb = pl.program_id(1)
    rows = tile_h * width
    cout_p = y_ref.shape[-1]

    acc = jnp.zeros((rows, cout_p), jnp.float32)
    for kh in range(n_kh):
        for kw in range(n_kw):
            start = (hb * tile_h + kh * dil) * width
            if width % 8 == 0:
                start = pl.multiple_of(start, 8)
            lhs = x_ref[kw, 0, pl.ds(start, rows), :]          # (rows, Cin) bf16
            acc = acc + jnp.dot(lhs, w_ref[kh * n_kw + kw],
                                preferred_element_type=jnp.float32)

    y_ref[...] = acc.astype(y_ref.dtype)
    stats_ref[0, 0:1, :] = jnp.sum(acc, axis=0, keepdims=True)
    stats_ref[0, 1:2, :] = jnp.sum(acc * acc, axis=0, keepdims=True)


def _bn_relu_kernel(y_ref, scale_ref, shift_ref, o_ref):
    """Fused per-channel affine (precomputed scale/shift) + ReLU."""
    y = y_ref[...].astype(jnp.float32)
    o_ref[...] = jnp.maximum(y * scale_ref[...] + shift_ref[...],
                             0.0).astype(o_ref.dtype)


def _row_tile(h, width, max_rows=128):
    cands = [t for t in range(1, h + 1) if h % t == 0 and (t * width) % 8 == 0]
    # TODO(synk): ragged/unaligned H*W tiles would need masked stores.
    assert cands, "cannot build a sublane-aligned row tile"
    small = [t for t in cands if t * width <= max_rows]
    return max(small) if small else min(cands)


def _m_tile(m, max_rows=256):
    best = None
    for t in range(8, min(m, max_rows) + 1, 8):
        if m % t == 0:
            best = t
    return best if best is not None else m


@functools.partial(jax.jit, static_argnames=("rate", "eps"))
def aspp_forward(x_nchw, weight, gamma, beta, *, rate, eps=1e-5):
    """ASPP_module forward: dilated conv -> BN (batch stats) -> ReLU."""
    N, Cin, H, W = x_nchw.shape
    Cout, _, KH, KW = weight.shape
    pad = 0 if KH == 1 else rate
    dil = rate
    Hp = H + 2 * pad
    taps = KH * KW
    M = N * H * W
    Cout_p = ((Cout + 127) // 128) * 128

    # ---- glue: NCHW->NHWC, spatial pad, KW horizontally shifted views ----
    x_nhwc = jnp.transpose(x_nchw, (0, 2, 3, 1))
    x_pad = jnp.pad(x_nhwc, ((0, 0), (pad, pad), (pad, pad), (0, 0)))
    shifts = [x_pad[:, :, kw * dil:kw * dil + W, :] for kw in range(KW)]
    x_shift = (jnp.stack(shifts, axis=0)
               .astype(jnp.bfloat16)
               .reshape(KW, N, Hp * W, Cin))

    # (Cout, Cin, KH, KW) -> (KH*KW, Cin, Cout_p), lane-padded, bf16
    w_k = jnp.transpose(weight, (2, 3, 1, 0)).reshape(taps, Cin, Cout)
    w_k = jnp.pad(w_k, ((0, 0), (0, 0), (0, Cout_p - Cout))).astype(jnp.bfloat16)

    TH = _row_tile(H, W)
    HB = H // TH
    nt = N * HB
    rows = TH * W

    flops = 2 * M * taps * Cin * Cout_p + 4 * M * Cout_p
    bytes_acc = (x_shift.size * 2 + w_k.size * 2
                 + M * Cout_p * 4 + nt * 2 * Cout_p * 4)

    # ---- pass 1: conv (implicit im2col) + partial BN stats ----
    y_flat, stats = pl.pallas_call(
        functools.partial(_conv_stats_kernel, tile_h=TH, width=W,
                          n_kh=KH, n_kw=KW, dil=dil),
        out_shape=(
            jax.ShapeDtypeStruct((M, Cout_p), jnp.float32),      # conv output
            jax.ShapeDtypeStruct((nt, 2, Cout_p), jnp.float32),  # partial stats
        ),
        grid=(N, HB),
        in_specs=[
            pl.BlockSpec((KW, 1, Hp * W, Cin), lambda n, hb: (0, n, 0, 0)),
            pl.BlockSpec((taps, Cin, Cout_p), lambda n, hb: (0, 0, 0)),
        ],
        out_specs=(
            pl.BlockSpec((rows, Cout_p), lambda n, hb: (n * HB + hb, 0)),
            pl.BlockSpec((1, 2, Cout_p), lambda n, hb: (n * HB + hb, 0, 0)),
        ),
        compiler_params=pltpu.CompilerParams(
            dimension_semantics=("parallel", "parallel")),
        cost_estimate=pl.CostEstimate(
            flops=flops, transcendentals=0, bytes_accessed=bytes_acc),
    )(x_shift, w_k)

    # ---- tiny channelwise finalize (glue): batch stats -> scale/shift ----
    tot = jnp.sum(stats[:, 0, :], axis=0)
    tot_sq = jnp.sum(stats[:, 1, :], axis=0)
    count = jnp.float32(M)
    mean = tot / count
    var = jnp.maximum(tot_sq / count - mean * mean, 0.0)   # biased variance
    inv = jax.lax.rsqrt(var + eps)
    gamma_p = jnp.pad(gamma.astype(jnp.float32), (0, Cout_p - Cout))
    beta_p = jnp.pad(beta.astype(jnp.float32), (0, Cout_p - Cout))
    scale = (gamma_p * inv).reshape(1, Cout_p)
    shift = (beta_p - mean * gamma_p * inv).reshape(1, Cout_p)

    # ---- pass 2: normalize + ReLU over lane-dense (TM, Cout_p) tiles ----
    TM = _m_tile(M)
    out_flat = pl.pallas_call(
        _bn_relu_kernel,
        out_shape=jax.ShapeDtypeStruct((M, Cout_p), x_nchw.dtype),
        grid=(M // TM,),
        in_specs=[
            pl.BlockSpec((TM, Cout_p), lambda i: (i, 0)),
            pl.BlockSpec((1, Cout_p), lambda i: (0, 0)),
            pl.BlockSpec((1, Cout_p), lambda i: (0, 0)),
        ],
        out_specs=pl.BlockSpec((TM, Cout_p), lambda i: (i, 0)),
        compiler_params=pltpu.CompilerParams(
            dimension_semantics=("parallel",)),
    )(y_flat, scale, shift)

    out = out_flat.reshape(N, H, W, Cout_p)[..., :Cout]
    return jnp.transpose(out, (0, 3, 1, 2))


def _reference_forward(x, weight, gamma, beta, *, rate, eps=1e-5,
                       matmul_dtype=None):
    """Pure-JAX reference (XLA conv + training-mode BN + ReLU)."""
    KH = weight.shape[2]
    pad = 0 if KH == 1 else rate
    lhs, rhs = x, weight
    if matmul_dtype is not None:
        lhs = lhs.astype(matmul_dtype)
        rhs = rhs.astype(matmul_dtype)
    y = jax.lax.conv_general_dilated(
        lhs, rhs,
        window_strides=(1, 1),
        padding=((pad, pad), (pad, pad)),
        rhs_dilation=(rate, rate),
        dimension_numbers=("NCHW", "OIHW", "NCHW"),
        preferred_element_type=jnp.float32,
        precision=jax.lax.Precision.HIGHEST,
    )
    mean = jnp.mean(y, axis=(0, 2, 3), keepdims=True)
    var = jnp.mean((y - mean) ** 2, axis=(0, 2, 3), keepdims=True)
    y = (y - mean) * jax.lax.rsqrt(var + eps)
    y = y * gamma.reshape(1, -1, 1, 1) + beta.reshape(1, -1, 1, 1)
    return jnp.maximum(y, 0.0)


if __name__ == "__main__":
    key = jax.random.PRNGKey(0)
    N, Cin, H, W = 2, 4, 16, 16
    Cout, rate = 8, 2
    KH = KW = 1 if rate == 1 else 3

    kx, kw_ = jax.random.split(key)
    x = jax.random.normal(kx, (N, Cin, H, W), dtype=jnp.float32)

    # Deterministic init mirroring the module's _init_weight:
    #   Conv2d: kaiming_normal_ (fan_in, gain sqrt(2)); BN: weight=1, bias=0.
    fan_in = Cin * KH * KW
    weight = jax.random.normal(kw_, (Cout, Cin, KH, KW), jnp.float32) * jnp.sqrt(
        2.0 / fan_in)
    gamma = jnp.ones((Cout,), jnp.float32)
    beta = jnp.zeros((Cout,), jnp.float32)

    y = aspp_forward(x, weight, gamma, beta, rate=rate)
    jax.block_until_ready(y)
    assert y.shape == (N, Cout, H, W), y.shape

    # Tight check vs a reference using the same bf16 operand quantization
    # (the kernel does bf16 x bf16 -> f32 accumulation on the MXU).
    y_ref_bf16 = _reference_forward(x, weight, gamma, beta, rate=rate,
                                    matmul_dtype=jnp.bfloat16)
    err_bf16 = float(jnp.max(jnp.abs(y - y_ref_bf16)))
    assert jnp.allclose(y, y_ref_bf16, rtol=2e-3, atol=2e-3), err_bf16

    # Looser sanity check vs the full-f32 reference (bf16 operand rounding).
    y_ref_f32 = _reference_forward(x, weight, gamma, beta, rate=rate)
    err_f32 = float(jnp.max(jnp.abs(y - y_ref_f32)))
    assert jnp.allclose(y, y_ref_f32, rtol=5e-2, atol=5e-2), err_f32

    print("KERNEL_OK")
</pallas_src>

<mosaic_0001>
module attributes {stable_mosaic.version = 11 : i64} {
  func.func @_conv_stats_kernel(%arg0: i32, %arg1: i32, %arg2: memref<3x1x320x4xbf16, #tpu.memory_space<vmem>>, %arg3: memref<9x4x128xbf16, #tpu.memory_space<vmem>>, %arg4: memref<128x128xf32, #tpu.memory_space<vmem>>, %arg5: memref<1x2x128xf32, #tpu.memory_space<vmem>>) attributes {dimension_semantics = [#tpu.dimension_semantics<parallel>, #tpu.dimension_semantics<parallel>], iteration_bounds = array<i64: 2, 2>, scalar_prefetch = 0 : i64, scratch_operands = 0 : i64, tpu.core_type = #tpu.core_type<tc>, window_params = [{transform_indices = @transform_0, window_bounds = array<i64: 3, 1, 320, 4>}, {pipeline_mode = #tpu.pipeline_mode<synchronous>, transform_indices = @transform_1, window_bounds = array<i64: 9, 4, 128>}, {transform_indices = @transform_2, window_bounds = array<i64: 128, 128>}, {transform_indices = @transform_3, window_bounds = array<i64: 1, 2, 128>}]} {
    %cst = arith.constant 0.000000e+00 : f32
    %0 = vector.broadcast %cst : f32 to vector<128x128xf32>
    %c8_i32 = arith.constant 8 : i32
    %1 = arith.muli %arg1, %c8_i32 : i32
    %c0_i32 = arith.constant 0 : i32
    %2 = arith.addi %1, %c0_i32 : i32
    %c16_i32 = arith.constant 16 : i32
    %3 = arith.muli %2, %c16_i32 : i32
    %4 = tpu.assume_multiple %3, 8 : i32
    %c0 = arith.constant 0 : index
    %c0_0 = arith.constant 0 : index
    %5 = arith.index_cast %4 : i32 to index
    %c0_1 = arith.constant 0 : index
    %6 = vector.load %arg2[%c0, %c0_0, %5, %c0_1] : memref<3x1x320x4xbf16, #tpu.memory_space<vmem>>, vector<1x1x128x4xbf16>
    %7 = vector.shape_cast %6 : vector<1x1x128x4xbf16> to vector<128x4xbf16>
    %c0_2 = arith.constant 0 : index
    %c0_3 = arith.constant 0 : index
    %c0_4 = arith.constant 0 : index
    %8 = vector.load %arg3[%c0_2, %c0_3, %c0_4] : memref<9x4x128xbf16, #tpu.memory_space<vmem>>, vector<1x4x128xbf16>
    %9 = vector.shape_cast %8 : vector<1x4x128xbf16> to vector<4x128xbf16>
    %cst_5 = arith.constant dense<0.000000e+00> : vector<128x128xf32>
    %10 = tpu.matmul %7, %9, %cst_5 {dimension_numbers = #tpu.dot_dimension_numbers<[1], [0], [0], [1], [0, 0, 1, 1], [], []>} : vector<128x4xbf16>, vector<4x128xbf16>, vector<128x128xf32> -> vector<128x128xf32>
    %11 = arith.addf %0, %10 : vector<128x128xf32>
    %c8_i32_6 = arith.constant 8 : i32
    %12 = arith.muli %arg1, %c8_i32_6 : i32
    %c0_i32_7 = arith.constant 0 : i32
    %13 = arith.addi %12, %c0_i32_7 : i32
    %c16_i32_8 = arith.constant 16 : i32
    %14 = arith.muli %13, %c16_i32_8 : i32
    %15 = tpu.assume_multiple %14, 8 : i32
    %c1 = arith.constant 1 : index
    %c0_9 = arith.constant 0 : index
    %16 = arith.index_cast %15 : i32 to index
    %c0_10 = arith.constant 0 : index
    %17 = vector.load %arg2[%c1, %c0_9, %16, %c0_10] : memref<3x1x320x4xbf16, #tpu.memory_space<vmem>>, vector<1x1x128x4xbf16>
    %18 = vector.shape_cast %17 : vector<1x1x128x4xbf16> to vector<128x4xbf16>
    %c1_11 = arith.constant 1 : index
    %c0_12 = arith.constant 0 : index
    %c0_13 = arith.constant 0 : index
    %19 = vector.load %arg3[%c1_11, %c0_12, %c0_13] : memref<9x4x128xbf16, #tpu.memory_space<vmem>>, vector<1x4x128xbf16>
    %20 = vector.shape_cast %19 : vector<1x4x128xbf16> to vector<4x128xbf16>
    %cst_14 = arith.constant dense<0.000000e+00> : vector<128x128xf32>
    %21 = tpu.matmul %18, %20, %cst_14 {dimension_numbers = #tpu.dot_dimension_numbers<[1], [0], [0], [1], [0, 0, 1, 1], [], []>} : vector<128x4xbf16>, vector<4x128xbf16>, vector<128x128xf32> -> vector<128x128xf32>
    %22 = arith.addf %11, %21 : vector<128x128xf32>
    %c8_i32_15 = arith.constant 8 : i32
    %23 = arith.muli %arg1, %c8_i32_15 : i32
    %c0_i32_16 = arith.constant 0 : i32
    %24 = arith.addi %23, %c0_i32_16 : i32
    %c16_i32_17 = arith.constant 16 : i32
    %25 = arith.muli %24, %c16_i32_17 : i32
    %26 = tpu.assume_multiple %25, 8 : i32
    %c2 = arith.constant 2 : index
    %c0_18 = arith.constant 0 : index
    %27 = arith.index_cast %26 : i32 to index
    %c0_19 = arith.constant 0 : index
    %28 = vector.load %arg2[%c2, %c0_18, %27, %c0_19] : memref<3x1x320x4xbf16, #tpu.memory_space<vmem>>, vector<1x1x128x4xbf16>
    %29 = vector.shape_cast %28 : vector<1x1x128x4xbf16> to vector<128x4xbf16>
    %c2_20 = arith.constant 2 : index
    %c0_21 = arith.constant 0 : index
    %c0_22 = arith.constant 0 : index
    %30 = vector.load %arg3[%c2_20, %c0_21, %c0_22] : memref<9x4x128xbf16, #tpu.memory_space<vmem>>, vector<1x4x128xbf16>
    %31 = vector.shape_cast %30 : vector<1x4x128xbf16> to vector<4x128xbf16>
    %cst_23 = arith.constant dense<0.000000e+00> : vector<128x128xf32>
    %32 = tpu.matmul %29, %31, %cst_23 {dimension_numbers = #tpu.dot_dimension_numbers<[1], [0], [0], [1], [0, 0, 1, 1], [], []>} : vector<128x4xbf16>, vector<4x128xbf16>, vector<128x128xf32> -> vector<128x128xf32>
    %33 = arith.addf %22, %32 : vector<128x128xf32>
    %c8_i32_24 = arith.constant 8 : i32
    %34 = arith.muli %arg1, %c8_i32_24 : i32
    %c2_i32 = arith.constant 2 : i32
    %35 = arith.addi %34, %c2_i32 : i32
    %c16_i32_25 = arith.constant 16 : i32
    %36 = arith.muli %35, %c16_i32_25 : i32
    %37 = tpu.assume_multiple %36, 8 : i32
    %c0_26 = arith.constant 0 : index
    %c0_27 = arith.constant 0 : index
    %38 = arith.index_cast %37 : i32 to index
    %c0_28 = arith.constant 0 : index
    %39 = vector.load %arg2[%c0_26, %c0_27, %38, %c0_28] : memref<3x1x320x4xbf16, #tpu.memory_space<vmem>>, vector<1x1x128x4xbf16>
    %40 = vector.shape_cast %39 : vector<1x1x128x4xbf16> to vector<128x4xbf16>
    %c3 = arith.constant 3 : index
    %c0_29 = arith.constant 0 : index
    %c0_30 = arith.constant 0 : index
    %41 = vector.load %arg3[%c3, %c0_29, %c0_30] : memref<9x4x128xbf16, #tpu.memory_space<vmem>>, vector<1x4x128xbf16>
    %42 = vector.shape_cast %41 : vector<1x4x128xbf16> to vector<4x128xbf16>
    %cst_31 = arith.constant dense<0.000000e+00> : vector<128x128xf32>
    %43 = tpu.matmul %40, %42, %cst_31 {dimension_numbers = #tpu.dot_dimension_numbers<[1], [0], [0], [1], [0, 0, 1, 1], [], []>} : vector<128x4xbf16>, vector<4x128xbf16>, vector<128x128xf32> -> vector<128x128xf32>
    %44 = arith.addf %33, %43 : vector<128x128xf32>
    %c8_i32_32 = arith.constant 8 : i32
    %45 = arith.muli %arg1, %c8_i32_32 : i32
    %c2_i32_33 = arith.constant 2 : i32
    %46 = arith.addi %45, %c2_i32_33 : i32
    %c16_i32_34 = arith.constant 16 : i32
    %47 = arith.muli %46, %c16_i32_34 : i32
    %48 = tpu.assume_multiple %47, 8 : i32
    %c1_35 = arith.constant 1 : index
    %c0_36 = arith.constant 0 : index
    %49 = arith.index_cast %48 : i32 to index
    %c0_37 = arith.constant 0 : index
    %50 = vector.load %arg2[%c1_35, %c0_36, %49, %c0_37] : memref<3x1x320x4xbf16, #tpu.memory_space<vmem>>, vector<1x1x128x4xbf16>
    %51 = vector.shape_cast %50 : vector<1x1x128x4xbf16> to vector<128x4xbf16>
    %c4 = arith.constant 4 : index
    %c0_38 = arith.constant 0 : index
    %c0_39 = arith.constant 0 : index
    %52 = vector.load %arg3[%c4, %c0_38, %c0_39] : memref<9x4x128xbf16, #tpu.memory_space<vmem>>, vector<1x4x128xbf16>
    %53 = vector.shape_cast %52 : vector<1x4x128xbf16> to vector<4x128xbf16>
    %cst_40 = arith.constant dense<0.000000e+00> : vector<128x128xf32>
    %54 = tpu.matmul %51, %53, %cst_40 {dimension_numbers = #tpu.dot_dimension_numbers<[1], [0], [0], [1], [0, 0, 1, 1], [], []>} : vector<128x4xbf16>, vector<4x128xbf16>, vector<128x128xf32> -> vector<128x128xf32>
    %55 = arith.addf %44, %54 : vector<128x128xf32>
    %c8_i32_41 = arith.constant 8 : i32
    %56 = arith.muli %arg1, %c8_i32_41 : i32
    %c2_i32_42 = arith.constant 2 : i32
    %57 = arith.addi %56, %c2_i32_42 : i32
    %c16_i32_43 = arith.constant 16 : i32
    %58 = arith.muli %57, %c16_i32_43 : i32
    %59 = tpu.assume_multiple %58, 8 : i32
    %c2_44 = arith.constant 2 : index
    %c0_45 = arith.constant 0 : index
    %60 = arith.index_cast %59 : i32 to index
    %c0_46 = arith.constant 0 : index
    %61 = vector.load %arg2[%c2_44, %c0_45, %60, %c0_46] : memref<3x1x320x4xbf16, #tpu.memory_space<vmem>>, vector<1x1x128x4xbf16>
    %62 = vector.shape_cast %61 : vector<1x1x128x4xbf16> to vector<128x4xbf16>
    %c5 = arith.constant 5 : index
    %c0_47 = arith.constant 0 : index
    %c0_48 = arith.constant 0 : index
    %63 = vector.load %arg3[%c5, %c0_47, %c0_48] : memref<9x4x128xbf16, #tpu.memory_space<vmem>>, vector<1x4x128xbf16>
    %64 = vector.shape_cast %63 : vector<1x4x128xbf16> to vector<4x128xbf16>
    %cst_49 = arith.constant dense<0.000000e+00> : vector<128x128xf32>
    %65 = tpu.matmul %62, %64, %cst_49 {dimension_numbers = #tpu.dot_dimension_numbers<[1], [0], [0], [1], [0, 0, 1, 1], [], []>} : vector<128x4xbf16>, vector<4x128xbf16>, vector<128x128xf32> -> vector<128x128xf32>
    %66 = arith.addf %55, %65 : vector<128x128xf32>
    %c8_i32_50 = arith.constant 8 : i32
    %67 = arith.muli %arg1, %c8_i32_50 : i32
    %c4_i32 = arith.constant 4 : i32
    %68 = arith.addi %67, %c4_i32 : i32
    %c16_i32_51 = arith.constant 16 : i32
    %69 = arith.muli %68, %c16_i32_51 : i32
    %70 = tpu.assume_multiple %69, 8 : i32
    %c0_52 = arith.constant 0 : index
    %c0_53 = arith.constant 0 : index
    %71 = arith.index_cast %70 : i32 to index
    %c0_54 = arith.constant 0 : index
    %72 = vector.load %arg2[%c0_52, %c0_53, %71, %c0_54] : memref<3x1x320x4xbf16, #tpu.memory_space<vmem>>, vector<1x1x128x4xbf16>
    %73 = vector.shape_cast %72 : vector<1x1x128x4xbf16> to vector<128x4xbf16>
    %c6 = arith.constant 6 : index
    %c0_55 = arith.constant 0 : index
    %c0_56 = arith.constant 0 : index
    %74 = vector.load %arg3[%c6, %c0_55, %c0_56] : memref<9x4x128xbf16, #tpu.memory_space<vmem>>, vector<1x4x128xbf16>
    %75 = vector.shape_cast %74 : vector<1x4x128xbf16> to vector<4x128xbf16>
    %cst_57 = arith.constant dense<0.000000e+00> : vector<128x128xf32>
    %76 = tpu.matmul %73, %75, %cst_57 {dimension_numbers = #tpu.dot_dimension_numbers<[1], [0], [0], [1], [0, 0, 1, 1], [], []>} : vector<128x4xbf16>, vector<4x128xbf16>, vector<128x128xf32> -> vector<128x128xf32>
    %77 = arith.addf %66, %76 : vector<128x128xf32>
    %c8_i32_58 = arith.constant 8 : i32
    %78 = arith.muli %arg1, %c8_i32_58 : i32
    %c4_i32_59 = arith.constant 4 : i32
    %79 = arith.addi %78, %c4_i32_59 : i32
    %c16_i32_60 = arith.constant 16 : i32
    %80 = arith.muli %79, %c16_i32_60 : i32
    %81 = tpu.assume_multiple %80, 8 : i32
    %c1_61 = arith.constant 1 : index
    %c0_62 = arith.constant 0 : index
    %82 = arith.index_cast %81 : i32 to index
    %c0_63 = arith.constant 0 : index
    %83 = vector.load %arg2[%c1_61, %c0_62, %82, %c0_63] : memref<3x1x320x4xbf16, #tpu.memory_space<vmem>>, vector<1x1x128x4xbf16>
    %84 = vector.shape_cast %83 : vector<1x1x128x4xbf16> to vector<128x4xbf16>
    %c7 = arith.constant 7 : index
    %c0_64 = arith.constant 0 : index
    %c0_65 = arith.constant 0 : index
    %85 = vector.load %arg3[%c7, %c0_64, %c0_65] : memref<9x4x128xbf16, #tpu.memory_space<vmem>>, vector<1x4x128xbf16>
    %86 = vector.shape_cast %85 : vector<1x4x128xbf16> to vector<4x128xbf16>
    %cst_66 = arith.constant dense<0.000000e+00> : vector<128x128xf32>
    %87 = tpu.matmul %84, %86, %cst_66 {dimension_numbers = #tpu.dot_dimension_numbers<[1], [0], [0], [1], [0, 0, 1, 1], [], []>} : vector<128x4xbf16>, vector<4x128xbf16>, vector<128x128xf32> -> vector<128x128xf32>
    %88 = arith.addf %77, %87 : vector<128x128xf32>
    %c8_i32_67 = arith.constant 8 : i32
    %89 = arith.muli %arg1, %c8_i32_67 : i32
    %c4_i32_68 = arith.constant 4 : i32
    %90 = arith.addi %89, %c4_i32_68 : i32
    %c16_i32_69 = arith.constant 16 : i32
    %91 = arith.muli %90, %c16_i32_69 : i32
    %92 = tpu.assume_multiple %91, 8 : i32
    %c2_70 = arith.constant 2 : index
    %c0_71 = arith.constant 0 : index
    %93 = arith.index_cast %92 : i32 to index
    %c0_72 = arith.constant 0 : index
    %94 = vector.load %arg2[%c2_70, %c0_71, %93, %c0_72] : memref<3x1x320x4xbf16, #tpu.memory_space<vmem>>, vector<1x1x128x4xbf16>
    %95 = vector.shape_cast %94 : vector<1x1x128x4xbf16> to vector<128x4xbf16>
    %c8 = arith.constant 8 : index
    %c0_73 = arith.constant 0 : index
    %c0_74 = arith.constant 0 : index
    %96 = vector.load %arg3[%c8, %c0_73, %c0_74] : memref<9x4x128xbf16, #tpu.memory_space<vmem>>, vector<1x4x128xbf16>
    %97 = vector.shape_cast %96 : vector<1x4x128xbf16> to vector<4x128xbf16>
    %cst_75 = arith.constant dense<0.000000e+00> : vector<128x128xf32>
    %98 = tpu.matmul %95, %97, %cst_75 {dimension_numbers = #tpu.dot_dimension_numbers<[1], [0], [0], [1], [0, 0, 1, 1], [], []>} : vector<128x4xbf16>, vector<4x128xbf16>, vector<128x128xf32> -> vector<128x128xf32>
    %99 = arith.addf %88, %98 : vector<128x128xf32>
    %c0_76 = arith.constant 0 : index
    %c0_77 = arith.constant 0 : index
    %100 = vector.load %arg4[%c0_76, %c0_77] : memref<128x128xf32, #tpu.memory_space<vmem>>, vector<128x128xf32>
    tpu.vector_store %arg4[%c0_76, %c0_77], %99 {strides = array<i32>} : memref<128x128xf32, #tpu.memory_space<vmem>>, vector<128x128xf32>,
    %cst_78 = arith.constant dense<0.000000e+00> : vector<128xf32>
    %101 = vector.multi_reduction <add>, %99, %cst_78 [0] : vector<128x128xf32> to vector<128xf32>
    %102 = vector.shape_cast %101 : vector<128xf32> to vector<1x128xf32>
    %c0_79 = arith.constant 0 : index
    %c0_80 = arith.constant 0 : index
    %c0_81 = arith.constant 0 : index
    %103 = vector.load %arg5[%c0_79, %c0_80, %c0_81] : memref<1x2x128xf32, #tpu.memory_space<vmem>>, vector<1x1x128xf32>
    %104 = vector.shape_cast %103 : vector<1x1x128xf32> to vector<1x128xf32>
    %105 = vector.shape_cast %102 : vector<1x128xf32> to vector<1x1x128xf32>
    tpu.vector_store %arg5[%c0_79, %c0_80, %c0_81], %105 {strides = array<i32>} : memref<1x2x128xf32, #tpu.memory_space<vmem>>, vector<1x1x128xf32>,
    %106 = arith.mulf %99, %99 : vector<128x128xf32>
    %cst_82 = arith.constant dense<0.000000e+00> : vector<128xf32>
    %107 = vector.multi_reduction <add>, %106, %cst_82 [0] : vector<128x128xf32> to vector<128xf32>
    %108 = vector.shape_cast %107 : vector<128xf32> to vector<1x128xf32>
    %c0_83 = arith.constant 0 : index
    %c1_84 = arith.constant 1 : index
    %c0_85 = arith.constant 0 : index
    %109 = vector.load %arg5[%c0_83, %c1_84, %c0_85] : memref<1x2x128xf32, #tpu.memory_space<vmem>>, vector<1x1x128xf32>
    %110 = vector.shape_cast %109 : vector<1x1x128xf32> to vector<1x128xf32>
    %111 = vector.shape_cast %108 : vector<1x128xf32> to vector<1x1x128xf32>
    tpu.vector_store %arg5[%c0_83, %c1_84, %c0_85], %111 {strides = array<i32>} : memref<1x2x128xf32, #tpu.memory_space<vmem>>, vector<1x1x128xf32>,
    return
  }
  func.func @transform_0(%arg0: i32, %arg1: i32) -> (i32, i32, i32, i32) {
    %c0_i32 = arith.constant 0 : i32
    %c0_i32_0 = arith.constant 0 : i32
    %c0_i32_1 = arith.constant 0 : i32
    %c0_i32_2 = arith.constant 0 : i32
    return %c0_i32, %arg0, %c0_i32_0, %c0_i32_1 : i32, i32, i32, i32
  }
  func.func @transform_1(%arg0: i32, %arg1: i32) -> (i32, i32, i32) {
    %c0_i32 = arith.constant 0 : i32
    %c0_i32_0 = arith.constant 0 : i32
    %c0_i32_1 = arith.constant 0 : i32
    %c0_i32_2 = arith.constant 0 : i32
    return %c0_i32, %c0_i32_0, %c0_i32_1 : i32, i32, i32
  }
  func.func @transform_2(%arg0: i32, %arg1: i32) -> (i32, i32) {
    %c2_i32 = arith.constant 2 : i32
    %0 = arith.muli %arg0, %c2_i32 : i32
    %1 = arith.addi %0, %arg1 : i32
    %c0_i32 = arith.constant 0 : i32
    %c0_i32_0 = arith.constant 0 : i32
    return %1, %c0_i32 : i32, i32
  }
  func.func @transform_3(%arg0: i32, %arg1: i32) -> (i32, i32, i32) {
    %c2_i32 = arith.constant 2 : i32
    %0 = arith.muli %arg0, %c2_i32 : i32
    %1 = arith.addi %0, %arg1 : i32
    %c0_i32 = arith.constant 0 : i32
    %c0_i32_0 = arith.constant 0 : i32
    %c0_i32_1 = arith.constant 0 : i32
    return %1, %c0_i32, %c0_i32_0 : i32, i32, i32
  }
}

module attributes {stable_mosaic.version = 11 : i64} {
  func.func @_bn_relu_kernel(%arg0: i32, %arg1: memref<256x128xf32, #tpu.memory_space<vmem>>, %arg2: memref<1x128xf32, #tpu.memory_space<vmem>>, %arg3: memref<1x128xf32, #tpu.memory_space<vmem>>, %arg4: memref<256x128xf32, #tpu.memory_space<vmem>>) attributes {dimension_semantics = [#tpu.dimension_semantics<parallel>], iteration_bounds = array<i64: 2>, scalar_prefetch = 0 : i64, scratch_operands = 0 : i64, tpu.core_type = #tpu.core_type<tc>, window_params = [{transform_indices = @transform_0, window_bounds = array<i64: 256, 128>}, {pipeline_mode = #tpu.pipeline_mode<synchronous>, transform_indices = @transform_1, window_bounds = array<i64: 1, 128>}, {pipeline_mode = #tpu.pipeline_mode<synchronous>, transform_indices = @transform_2, window_bounds = array<i64: 1, 128>}, {transform_indices = @transform_3, window_bounds = array<i64: 256, 128>}]} {
    %c0 = arith.constant 0 : index
    %c0_0 = arith.constant 0 : index
    %0 = vector.load %arg1[%c0, %c0_0] : memref<256x128xf32, #tpu.memory_space<vmem>>, vector<256x128xf32>
    %c0_1 = arith.constant 0 : index
    %c0_2 = arith.constant 0 : index
    %1 = vector.load %arg2[%c0_1, %c0_2] : memref<1x128xf32, #tpu.memory_space<vmem>>, vector<1x128xf32>
    %2 = vector.broadcast %1 : vector<1x128xf32> to vector<256x128xf32>
    %3 = arith.mulf %0, %2 : vector<256x128xf32>
    %c0_3 = arith.constant 0 : index
    %c0_4 = arith.constant 0 : index
    %4 = vector.load %arg3[%c0_3, %c0_4] : memref<1x128xf32, #tpu.memory_space<vmem>>, vector<1x128xf32>
    %5 = vector.broadcast %4 : vector<1x128xf32> to vector<256x128xf32>
    %6 = arith.addf %3, %5 : vector<256x128xf32>
    %cst = arith.constant 0.000000e+00 : f32
    %7 = vector.broadcast %cst : f32 to vector<256x128xf32>
    %8 = arith.maximumf %6, %7 : vector<256x128xf32>
    %c0_5 = arith.constant 0 : index
    %c0_6 = arith.constant 0 : index
    %9 = vector.load %arg4[%c0_5, %c0_6] : memref<256x128xf32, #tpu.memory_space<vmem>>, vector<256x128xf32>
    tpu.vector_store %arg4[%c0_5, %c0_6], %8 {strides = array<i32>} : memref<256x128xf32, #tpu.memory_space<vmem>>, vector<256x128xf32>,
    return
  }
  func.func @transform_0(%arg0: i32) -> (i32, i32) {
    %c0_i32 = arith.constant 0 : i32
    %c0_i32_0 = arith.constant 0 : i32
    return %arg0, %c0_i32 : i32, i32
  }
  func.func @transform_1(%arg0: i32) -> (i32, i32) {
    %c0_i32 = arith.constant 0 : i32
    %c0_i32_0 = arith.constant 0 : i32
    %c0_i32_1 = arith.constant 0 : i32
    return %c0_i32, %c0_i32_0 : i32, i32
  }
  func.func @transform_2(%arg0: i32) -> (i32, i32) {
    %c0_i32 = arith.constant 0 : i32
    %c0_i32_0 = arith.constant 0 : i32
    %c0_i32_1 = arith.constant 0 : i32
    return %c0_i32, %c0_i32_0 : i32, i32
  }
  func.func @transform_3(%arg0: i32) -> (i32, i32) {
    %c0_i32 = arith.constant 0 : i32
    %c0_i32_0 = arith.constant 0 : i32
    return %arg0, %c0_i32 : i32, i32
  }
}

</mosaic_0001>

<bundles_post_ra>
// kernel: aspp_forward.3
= control target key start
LH: loop header
LB: loop body
LE: loop exit
PB: predicated region body
PF: predicated region fallthrough
CT: control target
= control target key end

     0   :  { %s453_s12 = smov 0   ;;  %s612_s0 = inlined_call_operand.vmem [shape: f32[512,128], index: 0, kind: input, shape index: {}]   ;;  %s613_s1 = inlined_call_operand.vmem [shape: f32[1,128], index: 1, kind: input, shape index: {}]   ;;  %s614_s2 = inlined_call_operand.vmem [shape: f32[1,128], index: 2, kind: input, shape index: {}]   ;;  %s615_s3 = inlined_call_operand.vmem [shape: f32[512,128], index: 3, kind: output, shape index: {}]  }
   0x1 LB: > { %s404_s13 = sadd.s32 4294967295, %s431_s12   ;;  %p408_p0 = scmp.ge.s32.totalorder %s431_s12, 1  ;;  %s431_s12 = sphi %s453_s12, %s13_s12  }
   0x2   : > { %p138_p1 = scmp.lt.s32.totalorder %s431_s12, 3 }
   0x4   : > { %p139_p2 = pnand %p408_p0, %p138_p1 }
   0x5   : > { %s409_s14 = sshll.u32 (!%p139_p2), %s404_s13, 5  ;;  %v464_v0 = vld [vmem:[%s613_s1] ss:$0 sm:$0xff] (!%p139_p2) }
   0x6   : > { %142 = sbr.rel (%p139_p2) target bundleno = 46 (0x2e), region = 32  ;;  %p163_p3 = scmp.lt.s32.totalorder (!%p139_p2), %s409_s14, 63  ;;  %v474_v1 = vld [vmem:[%s614_s2] ss:$0 sm:$0xff] (!%p139_p2) }
   0xd   : > { %s617_s14 = smov (!%p163_p3, %s409_s14), 63 }
   0xe   : > { %s410_s15 = sshll.u32 %s617_s14, 3 }
   0xf   : > { %s469_s20 = scalar_lea.vmem %s612_s0, %s410_s15  ;;  %s497_s25 = scalar_lea.vmem %s615_s3, %s410_s15 }
  0x10   : > { %v174_v2 = vld [vmem:[%s469_s20] sm:$0xff]  ;;  %v175_v3 = vld [vmem:[%s469_s20 + $0x8] sm:$0xff]  ;;  %v176_v4 = vld [vmem:[%s469_s20 + $0x10] sm:$0xff] }
  0x11   : > { %v213_v5 = vmul.f32 %v464_v0, %v174_v2  ;;  %v214_v6 = vmul.f32 %v464_v0, %v175_v3  ;;  %v215_v7 = vmul.f32 %v464_v0, %v176_v4  ;;  %v177_v8 = vld [vmem:[%s469_s20 + $0x18] sm:$0xff]  ;;  %v178_v9 = vld [vmem:[%s469_s20 + $0x20] sm:$0xff]  ;;  %v179_v10 = vld [vmem:[%s469_s20 + $0x28] sm:$0xff] }
  0x12   : > { %v216_v11 = vmul.f32 %v464_v0, %v177_v8  ;;  %v217_v12 = vmul.f32 %v464_v0, %v178_v9  ;;  %v218_v13 = vmul.f32 %v464_v0, %v179_v10  ;;  %v180_v14 = vld [vmem:[%s469_s20 + $0x30] sm:$0xff]  ;;  %v181_v15 = vld [vmem:[%s469_s20 + $0x38] sm:$0xff]  ;;  %v182_v24 = vld [vmem:[%s469_s20 + $0x40] sm:$0xff] }
  0x13   : > { %v252_v16 = vadd.f32 %v474_v1, %v213_v5  ;;  %v253_v17 = vadd.f32 %v474_v1, %v214_v6  ;;  %v254_v18 = vadd.f32 %v474_v1, %v215_v7  ;;  %v219_v19 = vmul.f32 %v464_v0, %v180_v14  ;;  %v183_v25 = vld [vmem:[%s469_s20 + $0x48] sm:$0xff]  ;;  %v184_v26 = vld [vmem:[%s469_s20 + $0x50] sm:$0xff]  ;;  %v185_v31 = vld [vmem:[%s469_s20 + $0x58] sm:$0xff] }
  0x14   : > { %v255_v20 = vadd.f32 %v474_v1, %v216_v11  ;;  %v256_v21 = vadd.f32 %v474_v1, %v217_v12  ;;  %v257_v22 = vadd.f32 %v474_v1, %v218_v13  ;;  %v220_v23 = vmul.f32 %v464_v0, %v181_v15  ;;  %v186_v32 = vld [vmem:[%s469_s20 + $0x60] sm:$0xff]  ;;  %v187_v33 = vld [vmem:[%s469_s20 + $0x68] sm:$0xff]  ;;  %v188_v38 = vld [vmem:[%s469_s20 + $0x70] sm:$0xff] }
  0x15   : > { %v284_v27 = vmax.f32 %v252_v16, 0.0  ;;  %v285_v28 = vmax.f32 %v253_v17, 0.0  ;;  %v286_v29 = vmax.f32 %v254_v18, 0.0  ;;  %v258_v30 = vadd.f32 %v474_v1, %v219_v19  ;;  %v189_v43 = vld [vmem:[%s469_s20 + $0x78] sm:$0xff]  ;;  %v190_v56 = vld [vmem:[%s469_s20 + $0x80] sm:$0xff]  ;;  %v191_v57 = vld [vmem:[%s469_s20 + $0x88] sm:$0xff] }
  0x16   : > { %v287_v34 = vmax.f32 %v255_v20, 0.0  ;;  %v288_v35 = vmax.f32 %v256_v21, 0.0  ;;  %v289_v36 = vmax.f32 %v257_v22, 0.0  ;;  %v259_v37 = vadd.f32 %v474_v1, %v220_v23  ;;  %v192_v58 = vld [vmem:[%s469_s20 + $0x90] sm:$0xff]  ;;  %v193_v63 = vld [vmem:[%s469_s20 + $0x98] sm:$0xff]  ;;  %v194_v2 = vld [vmem:[%s469_s20 + $0xa0] sm:$0xff] }
  0x17   : > { %316 = vst [vmem:[%s497_s25] sm:$0xff] %v284_v27  ;;  %317 = vst [vmem:[%s497_s25 + $0x8] sm:$0xff] %v285_v28  ;;  %v290_v39 = vmax.f32 %v258_v30, 0.0  ;;  %v221_v40 = vmul.f32 %v464_v0, %v182_v24  ;;  %v222_v41 = vmul.f32 %v464_v0, %v183_v25  ;;  %v223_v42 = vmul.f32 %v464_v0, %v184_v26  ;;  %v195_v3 = vld [vmem:[%s469_s20 + $0xa8] sm:$0xff]  ;;  %v196_v8 = vld [vmem:[%s469_s20 + $0xb0] sm:$0xff] }
  0x18   : > { %318 = vst [vmem:[%s497_s25 + $0x10] sm:$0xff] %v286_v29  ;;  %319 = vst [vmem:[%s497_s25 + $0x18] sm:$0xff] %v287_v34  ;;  %v291_v44 = vmax.f32 %v259_v37, 0.0  ;;  %v224_v45 = vmul.f32 %v464_v0, %v185_v31  ;;  %v225_v46 = vmul.f32 %v464_v0, %v186_v32  ;;  %v226_v47 = vmul.f32 %v464_v0, %v187_v33  ;;  %v197_v13 = vld [vmem:[%s469_s20 + $0xb8] sm:$0xff]  ;;  %v198_v26 = vld [vmem:[%s469_s20 + $0xc0] sm:$0xff] }
  0x19   : > { %320 = vst [vmem:[%s497_s25 + $0x20] sm:$0xff] %v288_v35  ;;  %321 = vst [vmem:[%s497_s25 + $0x28] sm:$0xff] %v289_v36  ;;  %v260_v48 = vadd.f32 %v474_v1, %v221_v40  ;;  %v261_v49 = vadd.f32 %v474_v1, %v222_v41  ;;  %v262_v50 = vadd.f32 %v474_v1, %v223_v42  ;;  %v199_v27 = vld [vmem:[%s469_s20 + $0xc8] sm:$0xff]  ;;  %v200_v28 = vld [vmem:[%s469_s20 + $0xd0] sm:$0xff] }
  0x1a   : > { %322 = vst [vmem:[%s497_s25 + $0x30] sm:$0xff] %v290_v39  ;;  %v227_v51 = vmul.f32 %v464_v0, %v188_v38  ;;  %323 = vst [vmem:[%s497_s25 + $0x38] sm:$0xff] %v291_v44  ;;  %v263_v52 = vadd.f32 %v474_v1, %v224_v45  ;;  %v264_v53 = vadd.f32 %v474_v1, %v225_v46  ;;  %v201_v33 = vld [vmem:[%s469_s20 + $0xd8] sm:$0xff]  ;;  %v202_v34 = vld [vmem:[%s469_s20 + $0xe0] sm:$0xff] }
  0x1b   : > { %v265_v54 = vadd.f32 %v474_v1, %v226_v47  ;;  %v228_v55 = vmul.f32 %v464_v0, %v189_v43  ;;  %v292_v59 = vmax.f32 %v260_v48, 0.0  ;;  %v293_v60 = vmax.f32 %v261_v49, 0.0  ;;  %v203_v35 = vld [vmem:[%s469_s20 + $0xe8] sm:$0xff]  ;;  %v204_v40 = vld [vmem:[%s469_s20 + $0xf0] sm:$0xff]  ;;  %v205_v45 = vld [vmem:[%s469_s20 + $0xf8] sm:$0xff] }
  0x1c   : > { %v294_v61 = vmax.f32 %v262_v50, 0.0  ;;  %v266_v62 = vadd.f32 %v474_v1, %v227_v51  ;;  %v295_v4 = vmax.f32 %v263_v52, 0.0  ;;  %v296_v5 = vmax.f32 %v264_v53, 0.0 }
  0x1d   : > { %v297_v6 = vmax.f32 %v265_v54, 0.0  ;;  %v267_v7 = vadd.f32 %v474_v1, %v228_v55  ;;  %324 = vst [vmem:[%s497_s25 + $0x40] sm:$0xff] %v292_v59  ;;  %325 = vst [vmem:[%s497_s25 + $0x48] sm:$0xff] %v293_v60  ;;  %v229_v10 = vmul.f32 %v464_v0, %v190_v56  ;;  %v230_v11 = vmul.f32 %v464_v0, %v191_v57 }
  0x1e   : > { %326 = vst [vmem:[%s497_s25 + $0x50] sm:$0xff] %v294_v61  ;;  %v298_v9 = vmax.f32 %v266_v62, 0.0  ;;  %v231_v12 = vmul.f32 %v464_v0, %v192_v58  ;;  %327 = vst [vmem:[%s497_s25 + $0x58] sm:$0xff] %v295_v4  ;;  %v232_v15 = vmul.f32 %v464_v0, %v193_v63  ;;  %v233_v16 = vmul.f32 %v464_v0, %v194_v2 }
  0x1f   : > { %328 = vst [vmem:[%s497_s25 + $0x60] sm:$0xff] %v296_v5  ;;  %329 = vst [vmem:[%s497_s25 + $0x68] sm:$0xff] %v297_v6  ;;  %v299_v14 = vmax.f32 %v267_v7, 0.0  ;;  %v234_v17 = vmul.f32 %v464_v0, %v195_v3  ;;  %v268_v18 = vadd.f32 %v474_v1, %v229_v10  ;;  %v269_v19 = vadd.f32 %v474_v1, %v230_v11 }
  0x20   : > { %330 = vst [vmem:[%s497_s25 + $0x70] sm:$0xff] %v298_v9  ;;  %v270_v20 = vadd.f32 %v474_v1, %v231_v12  ;;  %v235_v21 = vmul.f32 %v464_v0, %v196_v8  ;;  %v271_v22 = vadd.f32 %v474_v1, %v232_v15  ;;  %v272_v23 = vadd.f32 %v474_v1, %v233_v16 }
  0x21   : > { %331 = vst [vmem:[%s497_s25 + $0x78] sm:$0xff] %v299_v14  ;;  %v273_v24 = vadd.f32 %v474_v1, %v234_v17  ;;  %v236_v25 = vmul.f32 %v464_v0, %v197_v13  ;;  %v300_v29 = vmax.f32 %v268_v18, 0.0  ;;  %v301_v30 = vmax.f32 %v269_v19, 0.0 }
  0x22   : > { %v302_v31 = vmax.f32 %v270_v20, 0.0  ;;  %v274_v32 = vadd.f32 %v474_v1, %v235_v21  ;;  %v303_v36 = vmax.f32 %v271_v22, 0.0  ;;  %v304_v37 = vmax.f32 %v272_v23, 0.0 }
  0x23   : > { %v305_v38 = vmax.f32 %v273_v24, 0.0  ;;  %v275_v39 = vadd.f32 %v474_v1, %v236_v25  ;;  %332 = vst [vmem:[%s497_s25 + $0x80] sm:$0xff] %v300_v29  ;;  %333 = vst [vmem:[%s497_s25 + $0x88] sm:$0xff] %v301_v30  ;;  %v237_v42 = vmul.f32 %v464_v0, %v198_v26  ;;  %v238_v43 = vmul.f32 %v464_v0, %v199_v27 }
  0x24   : > { %334 = vst [vmem:[%s497_s25 + $0x90] sm:$0xff] %v302_v31  ;;  %v306_v41 = vmax.f32 %v274_v32, 0.0  ;;  %v239_v44 = vmul.f32 %v464_v0, %v200_v28  ;;  %335 = vst [vmem:[%s497_s25 + $0x98] sm:$0xff] %v303_v36  ;;  %v240_v47 = vmul.f32 %v464_v0, %v201_v33  ;;  %v241_v48 = vmul.f32 %v464_v0, %v202_v34 }
  0x25   : > { %336 = vst [vmem:[%s497_s25 + $0xa0] sm:$0xff] %v304_v37  ;;  %337 = vst [vmem:[%s497_s25 + $0xa8] sm:$0xff] %v305_v38  ;;  %v307_v46 = vmax.f32 %v275_v39, 0.0  ;;  %v242_v49 = vmul.f32 %v464_v0, %v203_v35  ;;  %v276_v50 = vadd.f32 %v474_v1, %v237_v42  ;;  %v277_v51 = vadd.f32 %v474_v1, %v238_v43 }
  0x26   : > { %338 = vst [vmem:[%s497_s25 + $0xb0] sm:$0xff] %v306_v41  ;;  %v278_v52 = vadd.f32 %v474_v1, %v239_v44  ;;  %v243_v53 = vmul.f32 %v464_v0, %v204_v40  ;;  %v279_v54 = vadd.f32 %v474_v1, %v240_v47  ;;  %v280_v55 = vadd.f32 %v474_v1, %v241_v48 }
  0x27   : > { %339 = vst [vmem:[%s497_s25 + $0xb8] sm:$0xff] %v307_v46  ;;  %v281_v56 = vadd.f32 %v474_v1, %v242_v49  ;;  %v244_v57 = vmul.f32 %v464_v0, %v205_v45  ;;  %v308_v58 = vmax.f32 %v276_v50, 0.0  ;;  %v309_v59 = vmax.f32 %v277_v51, 0.0 }
  0x28   : > { %v310_v60 = vmax.f32 %v278_v52, 0.0  ;;  %v282_v61 = vadd.f32 %v474_v1, %v243_v53  ;;  %v311_v62 = vmax.f32 %v279_v54, 0.0  ;;  %v312_v63 = vmax.f32 %v280_v55, 0.0 }
  0x29   : > { %v313_v2 = vmax.f32 %v281_v56, 0.0  ;;  %v283_v3 = vadd.f32 %v474_v1, %v244_v57  ;;  %340 = vst [vmem:[%s497_s25 + $0xc0] sm:$0xff] %v308_v58  ;;  %341 = vst [vmem:[%s497_s25 + $0xc8] sm:$0xff] %v309_v59 }
  0x2a   : > { %342 = vst [vmem:[%s497_s25 + $0xd0] sm:$0xff] %v310_v60  ;;  %v314_v4 = vmax.f32 %v282_v61, 0.0  ;;  %343 = vst [vmem:[%s497_s25 + $0xd8] sm:$0xff] %v311_v62 }
  0x2b   : > { %344 = vst [vmem:[%s497_s25 + $0xe0] sm:$0xff] %v312_v63  ;;  %345 = vst [vmem:[%s497_s25 + $0xe8] sm:$0xff] %v313_v2  ;;  %v315_v0 = vmax.f32 %v283_v3, 0.0 }
  0x2c   : > { %346 = vst [vmem:[%s497_s25 + $0xf0] sm:$0xff] %v314_v4 }
  0x2d   : > { %347 = vst [vmem:[%s497_s25 + $0xf8] sm:$0xff] %v315_v0 }
  0x2e PF: > { %s13_s12 = sadd.s32 1, %s431_s12  }
  0x2f   : > { %p10_p4 = scmp.ge.s32.totalorder %s13_s12, 4  }
  0x31   :  { %12 = sbr.rel (!%p10_p4) target bundleno = 1 (0x1), region = 62 }

// kernel: aspp_forward.2
= control target key start
LH: loop header
LB: loop body
LE: loop exit
PB: predicated region body
PF: predicated region fallthrough
CT: control target
= control target key end

     0   :  { %s3612_s12 = smov 0   ;;  %s3614_s13 = smov 0   ;;  %s4064_s0 = inlined_call_operand.vmem [shape: bf16[3,2,320,4], index: 0, kind: input, shape index: {}]   ;;  %s4065_s1 = inlined_call_operand.vmem [shape: bf16[9,4,128], index: 1, kind: input, shape index: {}]   ;;  %s4066_s2 = inlined_call_operand.vmem [shape: f32[512,128], index: 2, kind: output, shape index: {0}]   ;;  %s4067_s3 = inlined_call_operand.vmem [shape: f32[4,2,128], index: 3, kind: output, shape index: {1}]  }
   0x1   :  { %s3616_s14 = smov 0   ;;  %s3618_s15 = smov 0  }
   0x2   :  { %s3620_s16 = smov 0   ;;  %s3622_s17 = smov 0  }
   0x3   :  { %s3624_s18 = smov 0  }
   0x4 LB: > { %s23_s19 = sadd.s32 1, %s3582_s16  ;;  %s26_s20 = sadd.s32 1, %s3586_s17  ;;  %s3590_s18 = sphi %s3624_s18, %s14_s18   ;;  %s3586_s17 = sphi %s3622_s17, %s4073_s17   ;;  %s3582_s16 = sphi %s3620_s16, %s4072_s16   ;;  %s3578_s15 = sphi %s3618_s15, %s4071_s15   ;;  %s3574_s14 = sphi %s3616_s14, %s4070_s14   ;;  %s3570_s13 = sphi %s3614_s13, %s4069_s13   ;;  %s3566_s12 = sphi %s3612_s12, %s4068_s12  }
   0x5   : > { %p24_p0 = scmp.ge.s32.totalorder %s23_s19, 2  ;;  %p40_p1 = scmp.ne.s32.totalorder %s3570_s13, %s3566_s12 }
   0x6   : > { %p41_p2 = scmp.eq.s32.totalorder %s3590_s18, 0  ;;  %s33_s22 = sadd.s32 1, %s3570_s13 }
   0x7   : > { %s4075_s19 = smov (%p24_p0, %s23_s19), 0  ;;  %s4077_s20 = smov (!%p24_p0, %s26_s20), %s3586_s17 }
   0x8   : > { %p42_p3 = por %p41_p2, %p40_p1  ;;  %p28_p4 = scmp.ge.s32.totalorder %s4077_s20, 2 }
   0x9   : > { %p2745_p6 = scmp.ge.s32.totalorder %s3590_s18, 4 }
   0xa   : > { %s4079_s20 = smov (%p28_p4, %s4077_s20), 0 }
   0xb   : > { %s30_s21 = ssub.s32 %s3586_s17, %s4079_s20  ;;  %150 = sbr.rel (%p2745_p6) target bundleno = 53 (0x35), region = 20 }
   0xc   : > { %p31_p5 = scmp.eq.s32.totalorder %s30_s21, 0 }
   0xe   : > { %s3661_s23 = scalar_select %p31_p5, %s3570_s13, %s33_s22  }
  0x12   : > { %153 = sbr.rel (!%p42_p3) target bundleno = 53 (0x35), region = 24  ;;  %s155_s24 = sand.u32 (%p42_p3), 1, %s3570_s13  }
  0x13   : > { %s3406_s25 = smul.u32 (%p42_p3), 160, %s3586_s17 }
  0x14   : > { %s3405_s26 = smul.u32 (%p42_p3), 480, %s155_s24 }
  0x15   : > { %s3669_s29 = scalar_lea.vmem (%p42_p3), %s4064_s0, %s3406_s25 }
  0x16   : > { %v176_v0 = vld [vmem:[%s3669_s29] sm:$0xff] (%p42_p3)   ;;  %v180_v1 = vld [vmem:[%s3669_s29 + $0x8] sm:$0xff] (%p42_p3)   ;;  %v184_v2 = vld [vmem:[%s3669_s29 + $0x10] sm:$0xff] (%p42_p3)   ;;  %s3674_s30 = scalar_lea.vmem (%p42_p3), [#allocation2], %s3405_s26 }
  0x17   : > { %177 = vst [vmem:[%s3674_s30] sm:$0xff] (%p42_p3), %v176_v0   ;;  %181 = vst [vmem:[%s3674_s30 + $0x8] sm:$0xff] (%p42_p3), %v180_v1   ;;  %v188_v3 = vld [vmem:[%s3669_s29 + $0x18] sm:$0xff] (%p42_p3)   ;;  %v192_v4 = vld [vmem:[%s3669_s29 + $0x20] sm:$0xff] (%p42_p3)  }
  0x18   : > { %185 = vst [vmem:[%s3674_s30 + $0x10] sm:$0xff] (%p42_p3), %v184_v2   ;;  %v196_v5 = vld [vmem:[%s3669_s29 + $0x28] sm:$0xff] (%p42_p3)   ;;  %189 = vst [vmem:[%s3674_s30 + $0x18] sm:$0xff] (%p42_p3), %v188_v3   ;;  %v200_v6 = vld [vmem:[%s3669_s29 + $0x30] sm:$0xff] (%p42_p3)  }
  0x19   : > { %193 = vst [vmem:[%s3674_s30 + $0x20] sm:$0xff] %v192_v4   ;;  %197 = vst [vmem:[%s3674_s30 + $0x28] sm:$0xff] %v196_v5   ;;  %v204_v7 = vld [vmem:[%s3669_s29 + $0x38] sm:$0xff]   ;;  %v208_v8 = vld [vmem:[%s3669_s29 + $0x40] sm:$0xff]  }
  0x1a   : > { %201 = vst [vmem:[%s3674_s30 + $0x30] sm:$0xff] %v200_v6   ;;  %205 = vst [vmem:[%s3674_s30 + $0x38] sm:$0xff] %v204_v7   ;;  %v212_v9 = vld [vmem:[%s3669_s29 + $0x48] sm:$0xff]   ;;  %v216_v10 = vld [vmem:[%s3669_s29 + $0x50] sm:$0xff]  }
  0x1b   : > { %209 = vst [vmem:[%s3674_s30 + $0x40] sm:$0xff] %v208_v8   ;;  %v220_v11 = vld [vmem:[%s3669_s29 + $0x58] sm:$0xff]   ;;  %213 = vst [vmem:[%s3674_s30 + $0x48] sm:$0xff] %v212_v9   ;;  %v224_v12 = vld [vmem:[%s3669_s29 + $0x60] sm:$0xff]  }
  0x1c   : > { %217 = vst [vmem:[%s3674_s30 + $0x50] sm:$0xff] %v216_v10   ;;  %221 = vst [vmem:[%s3674_s30 + $0x58] sm:$0xff] %v220_v11   ;;  %v228_v13 = vld [vmem:[%s3669_s29 + $0x68] sm:$0xff]   ;;  %v232_v14 = vld [vmem:[%s3669_s29 + $0x70] sm:$0xff]  }
  0x1d   : > { %225 = vst [vmem:[%s3674_s30 + $0x60] sm:$0xff] %v224_v12   ;;  %229 = vst [vmem:[%s3674_s30 + $0x68] sm:$0xff] %v228_v13   ;;  %v236_v15 = vld [vmem:[%s3669_s29 + $0x78] sm:$0xff]   ;;  %v240_v16 = vld [vmem:[%s3669_s29 + $0x80] sm:$0xff]  }
  0x1e   : > { %233 = vst [vmem:[%s3674_s30 + $0x70] sm:$0xff] %v232_v14   ;;  %v244_v17 = vld [vmem:[%s3669_s29 + $0x88] sm:$0xff]   ;;  %237 = vst [vmem:[%s3674_s30 + $0x78] sm:$0xff] %v236_v15   ;;  %v248_v18 = vld [vmem:[%s3669_s29 + $0x90] sm:$0xff]  }
  0x1f   : > { %241 = vst [vmem:[%s3674_s30 + $0x80] sm:$0xff] %v240_v16   ;;  %245 = vst [vmem:[%s3674_s30 + $0x88] sm:$0xff] %v244_v17   ;;  %v252_v19 = vld [vmem:[%s3669_s29 + $0x98] sm:$0xff]   ;;  %v256_v20 = vld [vmem:[%s3669_s29 + $0x140] sm:$0xff]  }
  0x20   : > { %249 = vst [vmem:[%s3674_s30 + $0x90] sm:$0xff] %v248_v18   ;;  %253 = vst [vmem:[%s3674_s30 + $0x98] sm:$0xff] %v252_v19   ;;  %v260_v21 = vld [vmem:[%s3669_s29 + $0x148] sm:$0xff]   ;;  %v264_v22 = vld [vmem:[%s3669_s29 + $0x150] sm:$0xff]  }
  0x21   : > { %257 = vst [vmem:[%s3674_s30 + $0xa0] sm:$0xff] %v256_v20   ;;  %v268_v23 = vld [vmem:[%s3669_s29 + $0x158] sm:$0xff]   ;;  %261 = vst [vmem:[%s3674_s30 + $0xa8] sm:$0xff] %v260_v21   ;;  %v272_v24 = vld [vmem:[%s3669_s29 + $0x160] sm:$0xff]  }
  0x22   : > { %265 = vst [vmem:[%s3674_s30 + $0xb0] sm:$0xff] %v264_v22   ;;  %269 = vst [vmem:[%s3674_s30 + $0xb8] sm:$0xff] %v268_v23   ;;  %v276_v25 = vld [vmem:[%s3669_s29 + $0x168] sm:$0xff]   ;;  %v280_v26 = vld [vmem:[%s3669_s29 + $0x170] sm:$0xff]  }
  0x23   : > { %273 = vst [vmem:[%s3674_s30 + $0xc0] sm:$0xff] %v272_v24   ;;  %277 = vst [vmem:[%s3674_s30 + $0xc8] sm:$0xff] %v276_v25   ;;  %v284_v27 = vld [vmem:[%s3669_s29 + $0x178] sm:$0xff]   ;;  %v288_v28 = vld [vmem:[%s3669_s29 + $0x180] sm:$0xff]  }
  0x24   : > { %281 = vst [vmem:[%s3674_s30 + $0xd0] sm:$0xff] %v280_v26   ;;  %v292_v29 = vld [vmem:[%s3669_s29 + $0x188] sm:$0xff]   ;;  %285 = vst [vmem:[%s3674_s30 + $0xd8] sm:$0xff] %v284_v27   ;;  %v296_v30 = vld [vmem:[%s3669_s29 + $0x190] sm:$0xff]  }
  0x25   : > { %289 = vst [vmem:[%s3674_s30 + $0xe0] sm:$0xff] %v288_v28   ;;  %293 = vst [vmem:[%s3674_s30 + $0xe8] sm:$0xff] %v292_v29   ;;  %v300_v31 = vld [vmem:[%s3669_s29 + $0x198] sm:$0xff]   ;;  %v304_v32 = vld [vmem:[%s3669_s29 + $0x1a0] sm:$0xff]  }
  0x26   : > { %297 = vst [vmem:[%s3674_s30 + $0xf0] sm:$0xff] %v296_v30   ;;  %301 = vst [vmem:[%s3674_s30 + $0xf8] sm:$0xff] %v300_v31   ;;  %v308_v33 = vld [vmem:[%s3669_s29 + $0x1a8] sm:$0xff]   ;;  %v312_v34 = vld [vmem:[%s3669_s29 + $0x1b0] sm:$0xff]  }
  0x27   : > { %305 = vst [vmem:[%s3674_s30 + $0x100] sm:$0xff] %v304_v32   ;;  %v316_v35 = vld [vmem:[%s3669_s29 + $0x1b8] sm:$0xff]   ;;  %309 = vst [vmem:[%s3674_s30 + $0x108] sm:$0xff] %v308_v33   ;;  %v320_v36 = vld [vmem:[%s3669_s29 + $0x1c0] sm:$0xff]  }
  0x28   : > { %313 = vst [vmem:[%s3674_s30 + $0x110] sm:$0xff] %v312_v34   ;;  %317 = vst [vmem:[%s3674_s30 + $0x118] sm:$0xff] %v316_v35   ;;  %v324_v37 = vld [vmem:[%s3669_s29 + $0x1c8] sm:$0xff]   ;;  %v328_v38 = vld [vmem:[%s3669_s29 + $0x1d0] sm:$0xff]  }
  0x29   : > { %321 = vst [vmem:[%s3674_s30 + $0x120] sm:$0xff] %v320_v36   ;;  %325 = vst [vmem:[%s3674_s30 + $0x128] sm:$0xff] %v324_v37   ;;  %v332_v39 = vld [vmem:[%s3669_s29 + $0x1d8] sm:$0xff]   ;;  %v336_v40 = vld [vmem:[%s3669_s29 + $0x280] sm:$0xff]  }
  0x2a   : > { %329 = vst [vmem:[%s3674_s30 + $0x130] sm:$0xff] %v328_v38   ;;  %v340_v41 = vld [vmem:[%s3669_s29 + $0x288] sm:$0xff]   ;;  %333 = vst [vmem:[%s3674_s30 + $0x138] sm:$0xff] %v332_v39   ;;  %v344_v42 = vld [vmem:[%s3669_s29 + $0x290] sm:$0xff]  }
  0x2b   : > { %337 = vst [vmem:[%s3674_s30 + $0x140] sm:$0xff] %v336_v40   ;;  %341 = vst [vmem:[%s3674_s30 + $0x148] sm:$0xff] %v340_v41   ;;  %v348_v43 = vld [vmem:[%s3669_s29 + $0x298] sm:$0xff]   ;;  %v352_v44 = vld [vmem:[%s3669_s29 + $0x2a0] sm:$0xff]  }
  0x2c   : > { %345 = vst [vmem:[%s3674_s30 + $0x150] sm:$0xff] %v344_v42   ;;  %349 = vst [vmem:[%s3674_s30 + $0x158] sm:$0xff] %v348_v43   ;;  %v356_v45 = vld [vmem:[%s3669_s29 + $0x2a8] sm:$0xff]   ;;  %v360_v46 = vld [vmem:[%s3669_s29 + $0x2b0] sm:$0xff]  }
  0x2d   : > { %353 = vst [vmem:[%s3674_s30 + $0x160] sm:$0xff] %v352_v44   ;;  %v364_v47 = vld [vmem:[%s3669_s29 + $0x2b8] sm:$0xff]   ;;  %357 = vst [vmem:[%s3674_s30 + $0x168] sm:$0xff] %v356_v45   ;;  %v368_v48 = vld [vmem:[%s3669_s29 + $0x2c0] sm:$0xff]  }
  0x2e   : > { %361 = vst [vmem:[%s3674_s30 + $0x170] sm:$0xff] %v360_v46   ;;  %365 = vst [vmem:[%s3674_s30 + $0x178] sm:$0xff] %v364_v47   ;;  %v372_v49 = vld [vmem:[%s3669_s29 + $0x2c8] sm:$0xff]   ;;  %v376_v50 = vld [vmem:[%s3669_s29 + $0x2d0] sm:$0xff]  }
  0x2f   : > { %369 = vst [vmem:[%s3674_s30 + $0x180] sm:$0xff] %v368_v48   ;;  %373 = vst [vmem:[%s3674_s30 + $0x188] sm:$0xff] %v372_v49   ;;  %v380_v51 = vld [vmem:[%s3669_s29 + $0x2d8] sm:$0xff]   ;;  %v384_v52 = vld [vmem:[%s3669_s29 + $0x2e0] sm:$0xff]  }
  0x30   : > { %377 = vst [vmem:[%s3674_s30 + $0x190] sm:$0xff] %v376_v50   ;;  %v388_v53 = vld [vmem:[%s3669_s29 + $0x2e8] sm:$0xff]   ;;  %381 = vst [vmem:[%s3674_s30 + $0x198] sm:$0xff] %v380_v51   ;;  %v392_v54 = vld [vmem:[%s3669_s29 + $0x2f0] sm:$0xff]  }
  0x31   : > { %385 = vst [vmem:[%s3674_s30 + $0x1a0] sm:$0xff] %v384_v52   ;;  %389 = vst [vmem:[%s3674_s30 + $0x1a8] sm:$0xff] %v388_v53   ;;  %v396_v55 = vld [vmem:[%s3669_s29 + $0x2f8] sm:$0xff]   ;;  %v400_v56 = vld [vmem:[%s3669_s29 + $0x300] sm:$0xff]  }
  0x32   : > { %393 = vst [vmem:[%s3674_s30 + $0x1b0] sm:$0xff] %v392_v54   ;;  %397 = vst [vmem:[%s3674_s30 + $0x1b8] sm:$0xff] %v396_v55   ;;  %v404_v57 = vld [vmem:[%s3669_s29 + $0x308] sm:$0xff]   ;;  %v408_v58 = vld [vmem:[%s3669_s29 + $0x310] sm:$0xff]  }
  0x33   : > { %401 = vst [vmem:[%s3674_s30 + $0x1c0] sm:$0xff] %v400_v56   ;;  %v412_v59 = vld [vmem:[%s3669_s29 + $0x318] sm:$0xff]   ;;  %405 = vst [vmem:[%s3674_s30 + $0x1c8] sm:$0xff] %v404_v57  }
  0x34   : > { %409 = vst [vmem:[%s3674_s30 + $0x1d0] sm:$0xff] %v408_v58   ;;  %413 = vst [vmem:[%s3674_s30 + $0x1d8] sm:$0xff] %v412_v59  }
  0x35 PF: > { %p2747_p7 = scmp.ge.s32.totalorder %s3590_s18, 1  ;;  %p677_p8 = scmp.lt.s32.totalorder %s3590_s18, 5 }
  0x37   : > { %p678_p9 = pnand %p2747_p7, %p677_p8 }
  0x38   : > { %v2772_v60 = vld [vmem:[%s4065_s1 + $0x2] sm:$0x3] (!%p678_p9)  ;;  %vm842_vm0 = vcmask (!%p678_p9), 1041408   ;;  %v3801_v61 = vld [vmem:[%s4065_s1 + $0x8] sm:$0x3] (!%p678_p9)  ;;  %s684_s8 = sand.u32 (!%p678_p9), 1, %s3566_s12  }
  0x39   : > { %681 = sbr.rel (%p678_p9) target bundleno = 440 (0x1b8), region = 65  ;;  %3395 = vmatprep.subr.msk.bf16.mxu1 (!%p678_p9), %vm842_vm0, %v2772_v60  ;;  %3399 = vmatprep.subr.msk.bf16.mxu0 (!%p678_p9), %vm842_vm0, %v3801_v61  ;;  %v844_v62 = vsel (!%p678_p9), %vm842_vm0, %v2772_v60, 0  ;;  %v3810_v63 = vsel (!%p678_p9), %vm842_vm0, %v3801_v61, 0  ;;  %s3813_s10 = sshll.u32 (!%p678_p9), %s3574_s14, 7  ;;  %v755_v0 = vld [vmem:[%s4065_s1] sm:$0x3] (!%p678_p9) }
  0x3a   : > { %s3407_s9 = smul.u32 (!%p678_p9), 480, %s684_s8  ;;  %3104 = vmatpush3.bf16.msra.mxu1 (!%p678_p9), %v844_v62  ;;  %3176 = vmatpush3.bf16.msra.mxu0 (!%p678_p9), %v3810_v63  ;;  %s735_s11 = sshra.s32 (!%p678_p9), %s3813_s10, 3  ;;  %v2910_v1 = vld [vmem:[%s4065_s1 + $0xa] sm:$0x3] (!%p678_p9)  ;;  %vm817_vm1 = vcmask (!%p678_p9), 31744   ;;  %v1008_v3 = vsel (!%p678_p9), %vm842_vm0, %v755_v0, 0 }
  0x3b   : > { %s2754_s25 = sshll.u32 (!%p678_p9), %s735_s11, 2  ;;  %3396 = vmatprep.subr.msk.bf16.mxu1 (!%p678_p9), %vm842_vm0, %v755_v0  ;;  %3401 = vmatprep.subr.msk.bf16.mxu0 (!%p678_p9), %vm842_vm0, %v2910_v1  ;;  %v2822_v4 = vld [vmem:[%s4065_s1 + $0x4] sm:$0x3] (!%p678_p9)  ;;  %s3017_s30 = sadd.s32 (!%p678_p9), 32, %s3813_s10  ;;  %v2929_v9 = vld [vmem:[%s4065_s1 + $0xc] sm:$0x3] (!%p678_p9) }
  0x3c   : > { %s3825_s26 = scalar_lea.vmem (!%p678_p9), [#allocation2], %s3407_s9  ;;  %s1311_s4 = sshra.s32 (!%p678_p9), %s3017_s30, 3  ;;  %v1800_v11 = vsel (!%p678_p9), %vm842_vm0, %v2910_v1, 0  ;;  %v2004_v19 = vsel (!%p678_p9), %vm842_vm0, %v2929_v9, 0  ;;  %v2963_v21 = vld [vmem:[%s4065_s1 + $0xe] sm:$0x3] (!%p678_p9) }
  0x3d   : > { %s3828_s27 = scalar_lea.vmem (!%p678_p9), %s3825_s26, %s2754_s25 [#allocation2]  ;;  %s2841_s5 = sshll.u32 (!%p678_p9), %s1311_s4, 2  ;;  %v1193_v28 = vsel (!%p678_p9), %vm842_vm0, %v2822_v4, 0  ;;  %v2842_v29 = vld [vmem:[%s4065_s1 + $0x6] sm:$0x3] (!%p678_p9)  ;;  %v2205_v40 = vsel (!%p678_p9), %vm842_vm0, %v2963_v21, 0 }
  0x3e   : > { %v3464_v2 = vld [vmem:[%s3828_s27 + $0xa0] sm:$0xff] (!%p678_p9)   ;;  %v3466_v5 = vld [vmem:[%s3828_s27 + $0xa8] sm:$0xff] (!%p678_p9)   ;;  %v3468_v6 = vld [vmem:[%s3828_s27 + $0xb0] sm:$0xff] (!%p678_p9)   ;;  %s3841_s6 = scalar_lea.vmem (!%p678_p9), %s3825_s26, %s2841_s5 [#allocation2]  ;;  %s3019_s9 = sadd.s32 (!%p678_p9), 64, %s3813_s10  ;;  %v1398_v48 = vsel (!%p678_p9), %vm842_vm0, %v2842_v29, 0 }
  0x3f   : > { %3105 = vmatprep.mubr.msk.bf16.mxu1 (!%p678_p9), %vm817_vm1, %v3464_v2  ;;  %v3465_v7 = vld [vmem:[%s3841_s6 + $0xa0] sm:$0xff] (!%p678_p9)   ;;  %v3470_v8 = vld [vmem:[%s3828_s27 + $0xb8] sm:$0xff] (!%p678_p9)   ;;  %v3467_v10 = vld [vmem:[%s3841_s6 + $0xa8] sm:$0xff] (!%p678_p9)   ;;  %s1917_s11 = sshra.s32 (!%p678_p9), %s3019_s9, 3 }
  0x40   : > { %3106 = vmatmul.mubr.msk.bf16.vlgmr.msra.gmra.mrb[0].mxu1 %vm817_vm1, %v3466_v5  ;;  %3177 = vmatprep.mubr.msk.bf16.mxu0 %vm817_vm1, %v3465_v7  ;;  %v3469_v12 = vld [vmem:[%s3841_s6 + $0xb0] sm:$0xff]   ;;  %v3472_v13 = vld [vmem:[%s3828_s27 + $0xc0] sm:$0xff]   ;;  %v3471_v14 = vld [vmem:[%s3841_s6 + $0xb8] sm:$0xff]   ;;  %s2928_s12 = sshll.u32 %s1917_s11, 2 }
  0x41   : > { %3122 = vmatpush3.bf16.msra.mxu1 %v1008_v3  ;;  %3109 = vmatprep.mubr.msk.bf16.mxu1 %vm817_vm1, %v3468_v6  ;;  %v3473_v15 = vld [vmem:[%s3841_s6 + $0x140] sm:$0xff]   ;;  %v3474_v16 = vld [vmem:[%s3828_s27 + $0xc8] sm:$0xff]   ;;  %v3476_v17 = vld [vmem:[%s3828_s27 + $0xd0] sm:$0xff]   ;;  %s3877_s22 = scalar_lea.vmem %s3825_s26, %s2928_s12 [#allocation2] }
  0x42   : > { %3397 = vmatprep.subr.msk.bf16.mxu1 %vm842_vm0, %v2822_v4  ;;  %3178 = vmatmul.mubr.msk.bf16.vlgmr.msra.gmra.mrb[0].mxu0 %vm817_vm1, %v3467_v10  ;;  %v3475_v18 = vld [vmem:[%s3841_s6 + $0x148] sm:$0xff]   ;;  %v3477_v20 = vld [vmem:[%s3841_s6 + $0x150] sm:$0xff]   ;;  %v3478_v22 = vld [vmem:[%s3828_s27 + $0xd8] sm:$0xff]  }
  0x43   : > { %3194 = vmatpush3.bf16.msra.mxu0 %v1800_v11  ;;  %3181 = vmatprep.mubr.msk.bf16.mxu0 %vm817_vm1, %v3469_v12  ;;  %v3480_v23 = vld [vmem:[%s3828_s27] sm:$0xff]   ;;  %v3479_v24 = vld [vmem:[%s3841_s6 + $0x158] sm:$0xff]   ;;  %v3482_v26 = vld [vmem:[%s3828_s27 + $0x8] sm:$0xff]  }
  0x44   : > { %3402 = vmatprep.subr.msk.bf16.mxu0 %vm842_vm0, %v2929_v9  ;;  %v3481_v25 = vld [vmem:[%s3841_s6 + $0x160] sm:$0xff]   ;;  %v3484_v27 = vld [vmem:[%s3828_s27 + $0x10] sm:$0xff]   ;;  %v3483_v30 = vld [vmem:[%s3841_s6 + $0x168] sm:$0xff]  }
  0x45   : > { %v3485_v31 = vld [vmem:[%s3841_s6 + $0x170] sm:$0xff]   ;;  %v3486_v32 = vld [vmem:[%s3828_s27 + $0x18] sm:$0xff]   ;;  %v3488_v33 = vld [vmem:[%s3828_s27 + $0x20] sm:$0xff]  }
  0x46   : > { %v3487_v34 = vld [vmem:[%s3841_s6 + $0x178] sm:$0xff]   ;;  %v3489_v35 = vld [vmem:[%s3877_s22] sm:$0xff]   ;;  %v3490_v36 = vld [vmem:[%s3828_s27 + $0x28] sm:$0xff]  }
  0x47   : > { %v3492_v37 = vld [vmem:[%s3828_s27 + $0x30] sm:$0xff]   ;;  %v3491_v38 = vld [vmem:[%s3877_s22 + $0x8] sm:$0xff]   ;;  %v3494_v41 = vld [vmem:[%s3828_s27 + $0x38] sm:$0xff]  }
  0x48   : > { %3110 = vmatmul.mubr.msk.bf16.gmra.mrb[4].mxu1 %vm817_vm1, %v3470_v8  ;;  %v3493_v39 = vld [vmem:[%s3877_s22 + $0x10] sm:$0xff]   ;;  %v3496_v43 = vld [vmem:[%s3828_s27 + $0x140] sm:$0xff]   ;;  %v3495_v44 = vld [vmem:[%s3877_s22 + $0x18] sm:$0xff]  }
  0x49   : > { %3113 = vmatprep.mubr.msk.bf16.mxu1 %vm817_vm1, %v3472_v13  ;;  %v2997_v42 = vld [vmem:[%s4065_s1 + $0x10] sm:$0x3]  ;;  %v3497_v45 = vld [vmem:[%s3877_s22 + $0x20] sm:$0xff]   ;;  %v3498_v46 = vld [vmem:[%s3828_s27 + $0x148] sm:$0xff]  }
  0x4a   : > { %3182 = vmatmul.mubr.msk.bf16.gmra.mrb[4].mxu0 %vm817_vm1, %v3471_v14  ;;  %v3500_v47 = vld [vmem:[%s3828_s27 + $0x150] sm:$0xff]   ;;  %v3499_v49 = vld [vmem:[%s3877_s22 + $0x28] sm:$0xff]   ;;  %v3502_v51 = vld [vmem:[%s3828_s27 + $0x158] sm:$0xff]   ;;  %v2406_v59 = vsel %vm842_vm0, %v2997_v42, 0 }
  0x4b   : > { %3195 = vmatprep.mubr.msk.bf16.mxu0 %vm817_vm1, %v3473_v15  ;;  %v3501_v50 = vld [vmem:[%s3877_s22 + $0x30] sm:$0xff]   ;;  %v3504_v52 = vld [vmem:[%s3828_s27 + $0x160] sm:$0xff]   ;;  %v3503_v53 = vld [vmem:[%s3877_s22 + $0x38] sm:$0xff]  }
  0x4c   : > { %v3505_v54 = vld [vmem:[%s3877_s22 + $0xa0] sm:$0xff]   ;;  %v3506_v55 = vld [vmem:[%s3828_s27 + $0x168] sm:$0xff]   ;;  %v3508_v56 = vld [vmem:[%s3828_s27 + $0x170] sm:$0xff]  }
  0x4d   : > { %v3507_v57 = vld [vmem:[%s3877_s22 + $0xa8] sm:$0xff]   ;;  %v3509_v58 = vld [vmem:[%s3877_s22 + $0xb0] sm:$0xff]   ;;  %v3510_v60 = vld [vmem:[%s3828_s27 + $0x178] sm:$0xff]   ;;  %s2748_s27 = sshll.u32 %s3578_s15, 1 }
  0x4e   : > { %v3511_v62 = vld [vmem:[%s3877_s22 + $0xb8] sm:$0xff]   ;;  %v3513_v0 = vld [vmem:[%s3877_s22 + $0xc0] sm:$0xff]   ;;  %v3514_v1 = vld [vmem:[%s3841_s6 + $0x8] sm:$0xff]   ;;  %s4014_s29 = sadd.s32 %s3574_s14, %s2748_s27 }
  0x4f   : > { %v3516_v2 = vld [vmem:[%s3841_s6 + $0x10] sm:$0xff]   ;;  %v3515_v3 = vld [vmem:[%s3877_s22 + $0xc8] sm:$0xff]   ;;  %v3518_v5 = vld [vmem:[%s3841_s6 + $0x18] sm:$0xff]   ;;  %s2749_s30 = sshll.u32 %s4014_s29, 4  ;;  %p727_p11 = scmp.lt.s32.totalorder %s4014_s29, 3 }
  0x50   : > { %3114 = vmatmul.mubr.msk.bf16.gmra.mrb[8].mxu1 %vm817_vm1, %v3474_v16  ;;  %v3517_v4 = vld [vmem:[%s3877_s22 + $0xd0] sm:$0xff]   ;;  %v3520_v6 = vld [vmem:[%s3841_s6 + $0x20] sm:$0xff]   ;;  %v3519_v7 = vld [vmem:[%s3877_s22 + $0xd8] sm:$0xff]   ;;  %p718_p10 = scmp.lt.s32.totalorder %s2749_s30, 63 }
  0x51   : > { %3117 = vmatprep.mubr.msk.bf16.mxu1 %vm817_vm1, %v3476_v17  ;;  %v3522_v8 = vld [vmem:[%s3841_s6 + $0x28] sm:$0xff]   ;;  %v3524_v9 = vld [vmem:[%s3841_s6 + $0x30] sm:$0xff]   ;;  %v3526_v12 = vld [vmem:[%s3841_s6 + $0x38] sm:$0xff]   ;;  %s4083_s29 = smov (!%p727_p11, %s4014_s29), 3 }
  0x52   : > { %3196 = vmatmul.mubr.msk.bf16.vlgmr.msra.gmra.mrb[0].mxu0 %vm817_vm1, %v3475_v18  ;;  %v3523_v10 = vld [vmem:[%s3877_s22 + $0x148] sm:$0xff]   ;;  %v3525_v11 = vld [vmem:[%s3877_s22 + $0x150] sm:$0xff]   ;;  %v3528_v13 = vld [vmem:[%s3841_s6 + $0xc0] sm:$0xff]   ;;  %s4081_s30 = smov (!%p718_p10, %s2749_s30), 63  ;;  %s2752_s14 = sshll.u32 %s4083_s29, 1 }
  0x53   : > { %3212 = vmatpush3.bf16.msra.mxu0 %v2004_v19  ;;  %3199 = vmatprep.mubr.msk.bf16.mxu0 %vm817_vm1, %v3477_v20  ;;  %v3527_v14 = vld [vmem:[%s3877_s22 + $0x158] sm:$0xff]   ;;  %v3529_v15 = vld [vmem:[%s3877_s22 + $0x160] sm:$0xff]   ;;  %v3530_v16 = vld [vmem:[%s3841_s6 + $0xc8] sm:$0xff]   ;;  %s2750_s4 = sshll.u32 %s4081_s30, 3  ;;  %s730_s9 = scalar_lea.vmem %s4067_s3, %s2752_s14 }
  0x54   : > { %3403 = vmatprep.subr.msk.bf16.mxu0 %vm842_vm0, %v2963_v21  ;;  %v3532_v17 = vld [vmem:[%s3841_s6 + $0xd0] sm:$0xff]   ;;  %v3531_v18 = vld [vmem:[%s3877_s22 + $0x168] sm:$0xff]   ;;  %v3534_v20 = vld [vmem:[%s3841_s6 + $0xd8] sm:$0xff]   ;;  %s4020_s7 = scalar_lea.vmem %s4066_s2, %s2750_s4 }
  0x55   : > { %v3533_v19 = vld [vmem:[%s3877_s22 + $0x170] sm:$0xff]   ;;  %v3535_v21 = vld [vmem:[%s3877_s22 + $0x178] sm:$0xff]  }
  0x58   : > { %3118 = vmatmul.mubr.msk.bf16.gmra.mrb[12].mxu1 %vm817_vm1, %v3478_v22 }
  0x59   : > { %3123 = vmatprep.mubr.msk.bf16.mxu1 %vm817_vm1, %v3480_v23 }
  0x5a   : > { %3200 = vmatmul.mubr.msk.bf16.gmra.mrb[4].mxu0 %vm817_vm1, %v3479_v24 }
  0x5b   : > { %3203 = vmatprep.mubr.msk.bf16.mxu0 %vm817_vm1, %v3481_v25 }
  0x60   : > { %3124 = vmatmul.mubr.msk.bf16.vlgmr.msra.gmra.mrb[0].mxu1 %vm817_vm1, %v3482_v26 }
  0x61   : > { %3140 = vmatpush3.bf16.msra.mxu1 %v1193_v28  ;;  %3127 = vmatprep.mubr.msk.bf16.mxu1 %vm817_vm1, %v3484_v27 }
  0x62   : > { %3398 = vmatprep.subr.msk.bf16.mxu1 %vm842_vm0, %v2842_v29  ;;  %3204 = vmatmul.mubr.msk.bf16.gmra.mrb[8].mxu0 %vm817_vm1, %v3483_v30 }
  0x63   : > { %3207 = vmatprep.mubr.msk.bf16.mxu0 %vm817_vm1, %v3485_v31 }
  0x68   : > { %3128 = vmatmul.mubr.msk.bf16.gmra.mrb[4].mxu1 %vm817_vm1, %v3486_v32 }
  0x69   : > { %3131 = vmatprep.mubr.msk.bf16.mxu1 %vm817_vm1, %v3488_v33 }
  0x6a   : > { %3208 = vmatmul.mubr.msk.bf16.gmra.mrb[12].mxu0 %vm817_vm1, %v3487_v34 }
  0x6b   : > { %3213 = vmatprep.mubr.msk.bf16.mxu0 %vm817_vm1, %v3489_v35 }
  0x70   : > { %3132 = vmatmul.mubr.msk.bf16.gmra.mrb[8].mxu1 %vm817_vm1, %v3490_v36 }
  0x71   : > { %3135 = vmatprep.mubr.msk.bf16.mxu1 %vm817_vm1, %v3492_v37 }
  0x72   : > { %3214 = vmatmul.mubr.msk.bf16.vlgmr.msra.gmra.mrb[0].mxu0 %vm817_vm1, %v3491_v38 }
  0x73   : > { %3230 = vmatpush3.bf16.msra.mxu0 %v2205_v40  ;;  %3217 = vmatprep.mubr.msk.bf16.mxu0 %vm817_vm1, %v3493_v39 }
  0x74   : > { %3404 = vmatprep.subr.msk.bf16.mxu0 %vm842_vm0, %v2997_v42 }
  0x78   : > { %3136 = vmatmul.mubr.msk.bf16.gmra.mrb[12].mxu1 %vm817_vm1, %v3494_v41 }
  0x79   : > { %3141 = vmatprep.mubr.msk.bf16.mxu1 %vm817_vm1, %v3496_v43 }
  0x7a   : > { %3218 = vmatmul.mubr.msk.bf16.gmra.mrb[4].mxu0 %vm817_vm1, %v3495_v44 }
  0x7b   : > { %3221 = vmatprep.mubr.msk.bf16.mxu0 %vm817_vm1, %v3497_v45 }
  0x80   : > { %3142 = vmatmul.mubr.msk.bf16.vlgmr.msra.gmra.mrb[0].mxu1 %vm817_vm1, %v3498_v46 }
  0x81   : > { %3158 = vmatpush3.bf16.msra.mxu1 %v1398_v48  ;;  %3145 = vmatprep.mubr.msk.bf16.mxu1 %vm817_vm1, %v3500_v47 }
  0x82   : > { %3400 = vmatprep.subr.msk.bf16.mxu1 %vm842_vm0, %v3801_v61  ;;  %3222 = vmatmul.mubr.msk.bf16.gmra.mrb[8].mxu0 %vm817_vm1, %v3499_v49  ;;  %v3512_v61 = vld [vmem:[%s3841_s6] sm:$0xff]  }
  0x83   : > { %3225 = vmatprep.mubr.msk.bf16.mxu0 %vm817_vm1, %v3501_v50 }
  0x88   : > { %3146 = vmatmul.mubr.msk.bf16.gmra.mrb[4].mxu1 %vm817_vm1, %v3502_v51 }
  0x89   : > { %3149 = vmatprep.mubr.msk.bf16.mxu1 %vm817_vm1, %v3504_v52 }
  0x8a   : > { %3226 = vmatmul.mubr.msk.bf16.gmra.mrb[12].mxu0 %vm817_vm1, %v3503_v53 }
  0x8b   : > { %3231 = vmatprep.mubr.msk.bf16.mxu0 %vm817_vm1, %v3505_v54 }
  0x90   : > { %3150 = vmatmul.mubr.msk.bf16.gmra.mrb[8].mxu1 %vm817_vm1, %v3506_v55 }
  0x91   : > { %3153 = vmatprep.mubr.msk.bf16.mxu1 %vm817_vm1, %v3508_v56 }
  0x92   : > { %3232 = vmatmul.mubr.msk.bf16.vlgmr.msra.gmra.mrb[0].mxu0 %vm817_vm1, %v3507_v57 }
  0x93   : > { %3248 = vmatpush3.bf16.msra.mxu0 %v2406_v59  ;;  %3235 = vmatprep.mubr.msk.bf16.mxu0 %vm817_vm1, %v3509_v58 }
  0x98   : > { %3154 = vmatmul.mubr.msk.bf16.gmra.mrb[12].mxu1 %vm817_vm1, %v3510_v60 }
  0x99   : > { %3159 = vmatprep.mubr.msk.bf16.mxu1 %vm817_vm1, %v3512_v61 }
  0x9a   : > { %3236 = vmatmul.mubr.msk.bf16.gmra.mrb[4].mxu0 %vm817_vm1, %v3511_v62 }
  0x9b   : > { %3239 = vmatprep.mubr.msk.bf16.mxu0 %vm817_vm1, %v3513_v0 }
  0xa0   : > { %3160 = vmatmul.mubr.msk.bf16.vlgmr.msra.gmra.mrb[0].mxu1 %vm817_vm1, %v3514_v1 }
  0xa1   : > { %3266 = vmatpush3.bf16.msra.mxu1 %v3810_v63  ;;  %3163 = vmatprep.mubr.msk.bf16.mxu1 %vm817_vm1, %v3516_v2  ;;  %v3521_v63 = vld [vmem:[%s3877_s22 + $0x140] sm:$0xff]  }
  0xa2   : > { %3240 = vmatmul.mubr.msk.bf16.gmra.mrb[8].mxu0 %vm817_vm1, %v3515_v3 }
  0xa3   : > { %3243 = vmatprep.mubr.msk.bf16.mxu0 %vm817_vm1, %v3517_v4 }
  0xa8   : > { %3164 = vmatmul.mubr.msk.bf16.gmra.mrb[4].mxu1 %vm817_vm1, %v3518_v5 }
  0xa9   : > { %3167 = vmatprep.mubr.msk.bf16.mxu1 %vm817_vm1, %v3520_v6 }
  0xaa   : > { %3244 = vmatmul.mubr.msk.bf16.gmra.mrb[12].mxu0 %vm817_vm1, %v3519_v7 }
  0xab   : > { %3249 = vmatprep.mubr.msk.bf16.mxu0 %vm817_vm1, %v3521_v63 }
  0xb0   : > { %3168 = vmatmul.mubr.msk.bf16.gmra.mrb[8].mxu1 %vm817_vm1, %v3522_v8 }
  0xb1   : > { %3171 = vmatprep.mubr.msk.bf16.mxu1 %vm817_vm1, %v3524_v9 }
  0xb2   : > { %3250 = vmatmul.mubr.msk.bf16.vlgmr.msra.gmra.mrb[0].mxu0 %vm817_vm1, %v3523_v10 }
  0xb3   : > { %3253 = vmatprep.mubr.msk.bf16.mxu0 %vm817_vm1, %v3525_v11 }
  0xb8   : > { %3172 = vmatmul.mubr.msk.bf16.gmra.mrb[12].mxu1 %vm817_vm1, %v3526_v12 }
  0xb9   : > { %3185 = vmatprep.mubr.msk.bf16.mxu1 %vm817_vm1, %v3528_v13 }
  0xba   : > { %3254 = vmatmul.mubr.msk.bf16.gmra.mrb[4].mxu0 %vm817_vm1, %v3527_v14 }
  0xbb   : > { %3257 = vmatprep.mubr.msk.bf16.mxu0 %vm817_vm1, %v3529_v15 }
  0xc0   : > { %3186 = vmatmul.mubr.msk.bf16.vlgmr.msra.gmra.mrb[8].mxu1 %vm817_vm1, %v3530_v16 }
  0xc1   : > { %3189 = vmatprep.mubr.msk.bf16.mxu1 %vm817_vm1, %v3532_v17 }
  0xc2   : > { %3258 = vmatmul.mubr.msk.bf16.gmra.mrb[8].mxu0 %vm817_vm1, %v3531_v18 }
  0xc3   : > { %3261 = vmatprep.mubr.msk.bf16.mxu0 %vm817_vm1, %v3533_v19 }
  0xc8   : > { %3190 = vmatmul.mubr.msk.bf16.gmra.mrb[12].mxu1 %vm817_vm1, %v3534_v20 }
  0xca   : > { %3262 = vmatmul.mubr.msk.bf16.gmra.mrb[12].mxu0 %vm817_vm1, %v3535_v21 }
 0x173   : > { %v3161_v22 = vpop.f32.mrb[0].mxu1 }
 0x174   : > { %v1434_v23 = vpop.f32.mrb[1].mxu1 }
 0x175   : > { %v3162_v24 = vpop.f32.mrb[2].mxu1 }
 0x176   : > { %v1437_v25 = vpop.f32.mrb[3].mxu1 }
 0x17b   : > { %v3165_v26 = vpop.f32.mrb[4].mxu1 }
 0x17c   : > { %v1450_v27 = vpop.f32.mrb[5].mxu1 }
 0x17d   : > { %v3166_v28 = vpop.f32.mrb[6].mxu1 }
 0x17e   : > { %v1453_v29 = vpop.f32.mrb[7].mxu1 }
 0x185   : > { %v3251_v30 = vpop.f32.mrb[0].mxu0 }
 0x186   : > { %v3267_v31 = vadd.f32 %v3251_v30, %v3161_v22  ;;  %v2442_v32 = vpop.f32.mrb[1].mxu0 }
 0x187   : > { %v3268_v33 = vadd.f32 %v2442_v32, %v1434_v23  ;;  %v3252_v34 = vpop.f32.mrb[2].mxu0 }
 0x188   : > { %2523 = vst [vmem:[%s4020_s7 + $0x10] sm:$0xff] %v3267_v31  ;;  %v3269_v35 = vadd.f32 %v3252_v34, %v3162_v24  ;;  %v2445_v36 = vpop.f32.mrb[3].mxu0  ;;  %v2561_v41 = vmul.f32 %v3267_v31, %v3267_v31 }
 0x189   : > { %2521 = vst [vmem:[%s4020_s7] sm:$0xff] %v3268_v33  ;;  %v3270_v37 = vadd.f32 %v2445_v36, %v1437_v25  ;;  %v2559_v38 = vmul.f32 %v3268_v33, %v3268_v33 }
 0x18a   : > { %2524 = vst [vmem:[%s4020_s7 + $0x18] sm:$0xff] %v3269_v35  ;;  %v2562_v47 = vmul.f32 %v3269_v35, %v3269_v35 }
 0x18b   : > { %2522 = vst [vmem:[%s4020_s7 + $0x8] sm:$0xff] %v3270_v37  ;;  %v2537_v39 = vadd.f32 %v3270_v37, %v3268_v33  ;;  %v2560_v40 = vmul.f32 %v3270_v37, %v3270_v37 }
 0x18d   : > { %v2538_v42 = vadd.f32 %v3267_v31, %v2537_v39  ;;  %v2575_v43 = vadd.f32 %v2560_v40, %v2559_v38  ;;  %v3255_v44 = vpop.f32.mrb[4].mxu0 }
 0x18e   : > { %v3271_v45 = vadd.f32 %v3255_v44, %v3165_v26  ;;  %v2458_v46 = vpop.f32.mrb[5].mxu0 }
 0x18f   : > { %v2576_v48 = vadd.f32 %v2575_v43, %v2561_v41  ;;  %v3272_v49 = vadd.f32 %v2458_v46, %v1450_v27  ;;  %v2539_v50 = vadd.f32 %v3269_v35, %v2538_v42  ;;  %v3256_v51 = vpop.f32.mrb[6].mxu0 }
 0x190   : > { %2527 = vst [vmem:[%s4020_s7 + $0x30] sm:$0xff] %v3271_v45  ;;  %v3273_v52 = vadd.f32 %v3256_v51, %v3166_v28  ;;  %v2461_v53 = vpop.f32.mrb[7].mxu0  ;;  %v2565_v2 = vmul.f32 %v3271_v45, %v3271_v45 }
 0x191   : > { %2525 = vst [vmem:[%s4020_s7 + $0x20] sm:$0xff] %v3272_v49  ;;  %v2540_v55 = vadd.f32 %v3272_v49, %v2539_v50  ;;  %v2563_v56 = vmul.f32 %v3272_v49, %v3272_v49  ;;  %v2577_v57 = vadd.f32 %v2576_v48, %v2562_v47  ;;  %v3274_v58 = vadd.f32 %v2461_v53, %v1453_v29 }
 0x192   : > { %2528 = vst [vmem:[%s4020_s7 + $0x38] sm:$0xff] %v3273_v52  ;;  %v2566_v63 = vmul.f32 %v3273_v52, %v3273_v52 }
 0x193   : > { %v3187_v54 = vpop.f32.mrb[8].mxu1  ;;  %v2578_v61 = vadd.f32 %v2577_v57, %v2563_v56  ;;  %2526 = vst [vmem:[%s4020_s7 + $0x28] sm:$0xff] %v3274_v58  ;;  %v2541_v62 = vadd.f32 %v3274_v58, %v2540_v55  ;;  %v2564_v0 = vmul.f32 %v3274_v58, %v3274_v58 }
 0x194   : > { %v1667_v59 = vpop.f32.mrb[9].mxu1 }
 0x195   : > { %v3188_v60 = vpop.f32.mrb[10].mxu1  ;;  %v2542_v3 = vadd.f32 %v3271_v45, %v2541_v62  ;;  %v2579_v4 = vadd.f32 %v2578_v61, %v2564_v0  ;;  %v3259_v5 = vpop.f32.mrb[8].mxu0 }
 0x196   : > { %v1670_v1 = vpop.f32.mrb[11].mxu1  ;;  %v3275_v6 = vadd.f32 %v3259_v5, %v3187_v54  ;;  %v2474_v7 = vpop.f32.mrb[9].mxu0 }
 0x197   : > { %v2580_v8 = vadd.f32 %v2579_v4, %v2565_v2  ;;  %v3276_v9 = vadd.f32 %v2474_v7, %v1667_v59  ;;  %v2543_v10 = vadd.f32 %v3273_v52, %v2542_v3  ;;  %v3260_v11 = vpop.f32.mrb[10].mxu0 }
 0x198   : > { %2531 = vst [vmem:[%s4020_s7 + $0x50] sm:$0xff] %v3275_v6  ;;  %v3277_v12 = vadd.f32 %v3260_v11, %v3188_v60  ;;  %v2477_v13 = vpop.f32.mrb[11].mxu0  ;;  %v2569_v25 = vmul.f32 %v3275_v6, %v3275_v6 }
 0x199   : > { %2529 = vst [vmem:[%s4020_s7 + $0x40] sm:$0xff] %v3276_v9  ;;  %v2544_v15 = vadd.f32 %v3276_v9, %v2543_v10  ;;  %v2567_v16 = vmul.f32 %v3276_v9, %v3276_v9  ;;  %v2581_v17 = vadd.f32 %v2580_v8, %v2566_v63  ;;  %v3278_v18 = vadd.f32 %v2477_v13, %v1670_v1 }
 0x19a   : > { %2532 = vst [vmem:[%s4020_s7 + $0x58] sm:$0xff] %v3277_v12  ;;  %v2570_v31 = vmul.f32 %v3277_v12, %v3277_v12 }
 0x19b   : > { %v3191_v14 = vpop.f32.mrb[12].mxu1  ;;  %v2582_v21 = vadd.f32 %v2581_v17, %v2567_v16  ;;  %2530 = vst [vmem:[%s4020_s7 + $0x48] sm:$0xff] %v3278_v18  ;;  %v2545_v22 = vadd.f32 %v3278_v18, %v2544_v15  ;;  %v2568_v23 = vmul.f32 %v3278_v18, %v3278_v18 }
 0x19c   : > { %v1683_v19 = vpop.f32.mrb[13].mxu1 }
 0x19d   : > { %v3192_v20 = vpop.f32.mrb[14].mxu1  ;;  %v2546_v26 = vadd.f32 %v3275_v6, %v2545_v22  ;;  %v2583_v27 = vadd.f32 %v2582_v21, %v2568_v23  ;;  %v3263_v28 = vpop.f32.mrb[12].mxu0 }
 0x19e   : > { %v1686_v24 = vpop.f32.mrb[15].mxu1  ;;  %v3279_v29 = vadd.f32 %v3263_v28, %v3191_v14  ;;  %v2490_v30 = vpop.f32.mrb[13].mxu0 }
 0x19f   : > { %v2584_v32 = vadd.f32 %v2583_v27, %v2569_v25  ;;  %v3280_v33 = vadd.f32 %v2490_v30, %v1683_v19  ;;  %v2547_v34 = vadd.f32 %v3277_v12, %v2546_v26  ;;  %v3264_v35 = vpop.f32.mrb[14].mxu0 }
 0x1a0   : > { %2535 = vst [vmem:[%s4020_s7 + $0x70] sm:$0xff] %v3279_v29  ;;  %v3281_v36 = vadd.f32 %v3264_v35, %v3192_v20  ;;  %v2493_v37 = vpop.f32.mrb[15].mxu0  ;;  %v2573_v45 = vmul.f32 %v3279_v29, %v3279_v29 }
 0x1a1   : > { %2533 = vst [vmem:[%s4020_s7 + $0x60] sm:$0xff] %v3280_v33  ;;  %v2548_v38 = vadd.f32 %v3280_v33, %v2547_v34  ;;  %v2571_v39 = vmul.f32 %v3280_v33, %v3280_v33  ;;  %v2585_v40 = vadd.f32 %v2584_v32, %v2570_v31  ;;  %v3282_v41 = vadd.f32 %v2493_v37, %v1686_v24 }
 0x1a2   : > { %2536 = vst [vmem:[%s4020_s7 + $0x78] sm:$0xff] %v3281_v36  ;;  %v2574_v48 = vmul.f32 %v3281_v36, %v3281_v36 }
 0x1a3   : > { %v2586_v42 = vadd.f32 %v2585_v40, %v2571_v39  ;;  %2534 = vst [vmem:[%s4020_s7 + $0x68] sm:$0xff] %v3282_v41  ;;  %v2549_v43 = vadd.f32 %v3282_v41, %v2548_v38  ;;  %v2572_v44 = vmul.f32 %v3282_v41, %v3282_v41 }
 0x1a5   : > { %v2550_v46 = vadd.f32 %v3279_v29, %v2549_v43  ;;  %v2587_v47 = vadd.f32 %v2586_v42, %v2572_v44 }
 0x1a7   : > { %v2551_v49 = vadd.f32 %v3281_v36, %v2550_v46  ;;  %v2588_v50 = vadd.f32 %v2587_v47, %v2573_v45 }
 0x1a9   : > { %v2552_v51 = vrot.slane %v2551_v49, 4  ;;  %v2589_v52 = vadd.f32 %v2588_v50, %v2574_v48 }
 0x1ab   : > { %v2553_v53 = vadd.f32 %v2552_v51, %v2551_v49  ;;  %v2590_v54 = vrot.slane %v2589_v52, 4 }
 0x1ad   : > { %v2554_v55 = vrot.slane %v2553_v53, 2  ;;  %v2591_v56 = vadd.f32 %v2590_v54, %v2589_v52 }
 0x1af   : > { %v2555_v57 = vadd.f32 %v2554_v55, %v2553_v53  ;;  %v2592_v58 = vrot.slane %v2591_v56, 2 }
 0x1b1   : > { %v2556_v59 = vrot.slane %v2555_v57, 1  ;;  %v2593_v60 = vadd.f32 %v2592_v58, %v2591_v56 }
 0x1b3   : > { %v2557_v61 = vadd.f32 %v2556_v59, %v2555_v57  ;;  %v2594_v62 = vrot.slane %v2593_v60, 1 }
 0x1b5   : > { %2558 = vst [vmem:[%s730_s9] sm:$0x1] %v2557_v61  ;;  %v2595_v0 = vadd.f32 %v2594_v62, %v2593_v60 }
 0x1b7   : > { %2596 = vst [vmem:[%s730_s9 + $0x1] sm:$0x1] %v2595_v0 }
 0x1b8 PF: > { %s14_s18 = sadd.s32 1, %s3590_s18   ;;  %s4068_s12 = smov %s3570_s13 }
 0x1b9   : > { %p11_p12 = scmp.ge.s32.totalorder %s14_s18, 6   ;;  %s4069_s13 = smov %s3661_s23 }
 0x1ba   : > { %s4070_s14 = smov %s3582_s16  ;;  %s4071_s15 = smov %s3586_s17 }
 0x1bb   : > { %s4072_s16 = smov %s4075_s19  ;;  %s4073_s17 = smov %s4079_s20 }
 0x1bc   :  { %13 = sbr.rel (!%p11_p12) target bundleno = 4 (0x4), region = 133 }

</bundles_post_ra>
